<compile_context>
chip_gen: v7x
topology: tpu7x:2x2x1
jax: 0.10.0
libtpu: 0.0.40
codegen_flags: <defaults>
</compile_context>

<pallas_src>
import functools

import numpy as np
import jax
import jax.numpy as jnp
from jax import lax
from jax.experimental import pallas as pl
from jax.experimental.pallas import tpu as pltpu


# -----------------------------------------------------------------------------
# Helpers
# -----------------------------------------------------------------------------
def _layernorm(v, g, b, eps=1e-5):
    mu = jnp.mean(v, axis=-1, keepdims=True)
    var = jnp.mean(jnp.square(v - mu), axis=-1, keepdims=True)
    return (v - mu) * lax.rsqrt(var + eps) * g + b


# -----------------------------------------------------------------------------
# Fused kernel: mlp_in + PE + (object, time) x num_layers encoder blocks + mlp_out
# Grid: (2 * num_layers,) — one encoder block per step; activation resident in VMEM.
# -----------------------------------------------------------------------------
def _ocvp_fused_kernel(x_in_ref, pe_ref, min_w_ref, min_b_ref, mout_w_ref, mout_b_ref,
                       gidr_ref, gidc_ref, wqkv_ref, wo_ref, w1_ref, w2_ref,
                       vec_ref, b1_ref, o_ref, act_ref, *, num_heads, residual):
    i = pl.program_id(0)
    n_steps = pl.num_programs(0)
    M, D = act_ref.shape
    H = num_heads
    hd = D // H
    scale = 1.0 / float(hd) ** 0.5

    # ---- step 0: mlp_in + positional encoding -> resident activation -------
    @pl.when(i == 0)
    def _():
        x0 = jnp.dot(x_in_ref[...].astype(jnp.bfloat16), min_w_ref[...],
                     preferred_element_type=jnp.float32)
        act_ref[...] = x0 + min_b_ref[...] + pe_ref[...]

    # ---- attention mask for this view (even step: object, odd step: time) --
    sel = i % 2
    gr = gidr_ref[sel]                                # (M, 1) int32 group id per row
    gc = gidc_ref[sel]                                # (1, M) int32 group id per col
    bias = jnp.where(gr == gc, 0.0, -1e30).astype(jnp.float32)   # (M, M)

    # ---- packed per-token vectors ------------------------------------------
    vec = vec_ref[0]                                  # (9, D) f32
    ln1_g, ln1_b = vec[0:1, :], vec[1:2, :]
    ln2_g, ln2_b = vec[2:3, :], vec[3:4, :]
    bq, bk, bv = vec[4:5, :], vec[5:6, :], vec[6:7, :]
    bo, b2 = vec[7:8, :], vec[8:9, :]

    # ---- pre-norm multi-head self-attention (fused QKV, bf16 matmuls) ------
    x = act_ref[...]                                  # (M, D) f32
    z = _layernorm(x, ln1_g, ln1_b).astype(jnp.bfloat16)
    qkv = jnp.dot(z, wqkv_ref[0], preferred_element_type=jnp.float32)   # (M, 3D)
    q = ((qkv[:, :D] + bq) * scale).astype(jnp.bfloat16)
    k = (qkv[:, D:2 * D] + bk).astype(jnp.bfloat16)
    v = (qkv[:, 2 * D:] + bv).astype(jnp.bfloat16)
    wo = wo_ref[0]                                    # (D, D) bf16

    att = jnp.zeros((M, D), jnp.float32)
    for h in range(H):                                # small static head loop
        lo, hi = h * hd, (h + 1) * hd
        s = lax.dot_general(q[:, lo:hi], k[:, lo:hi],
                            (((1,), (1,)), ((), ())),
                            preferred_element_type=jnp.float32)          # (M, M)
        s = s + bias
        s = s - jnp.max(s, axis=-1, keepdims=True)
        p = jnp.exp(s)
        p = p / jnp.sum(p, axis=-1, keepdims=True)
        # reassociated epilogue: (v_h @ Wo_h) first -> D-wide outputs, M-wide contraction
        vo = jnp.dot(v[:, lo:hi], wo[lo:hi, :],
                     preferred_element_type=jnp.float32)                 # (M, D)
        att = att + jnp.dot(p.astype(jnp.bfloat16), vo.astype(jnp.bfloat16),
                            preferred_element_type=jnp.float32)
    y = x + att + bo

    # ---- pre-norm MLP --------------------------------------------------------
    z2 = _layernorm(y, ln2_g, ln2_b).astype(jnp.bfloat16)
    h1 = jnp.dot(z2, w1_ref[0], preferred_element_type=jnp.float32) + b1_ref[0]
    h1 = jax.nn.gelu(h1, approximate=True)   # TODO(synk): erf GELU for exact parity
    h2 = jnp.dot(h1.astype(jnp.bfloat16), w2_ref[0],
                 preferred_element_type=jnp.float32) + b2
    act_ref[...] = y + h2

    # ---- last step: mlp_out (+ optional residual) ----------------------------
    @pl.when(i == n_steps - 1)
    def _():
        out = jnp.dot(act_ref[...].astype(jnp.bfloat16), mout_w_ref[...],
                      preferred_element_type=jnp.float32) + mout_b_ref[...]
        if residual:
            out = out + x_in_ref[...]
        o_ref[...] = out.astype(o_ref.dtype)


def ocvp_seq_forward(inputs, params, *, num_heads, residual=False):
    """inputs: (B, num_imgs, num_slots, slot_dim) -> same shape."""
    B, T, N, Ds = inputs.shape
    Dt = params["mlp_in_w"].shape[1]
    M = B * T * N
    NB = params["wqkv"].shape[0]                       # 2 * num_layers encoder blocks

    x2 = inputs.reshape(M, Ds)
    pe_slab = jnp.broadcast_to(params["pe"][None, :T, None, :],
                               (B, T, N, Dt)).reshape(M, Dt)

    # group ids: object view groups tokens by (b, t); time view groups by (b, n)
    idx = np.arange(M)
    gid_obj = idx // N
    gid_time = (idx // (T * N)) * N + (idx % N)
    gids = np.stack([gid_obj, gid_time], axis=0).astype(np.int32)   # (2, M)
    gid_rows = jnp.asarray(gids[:, :, None])           # (2, M, 1)
    gid_cols = jnp.asarray(gids[:, None, :])           # (2, 1, M)

    const2 = lambda i: (0, 0)
    const3 = lambda i: (0, 0, 0)
    perblk = lambda i: (i, 0, 0)

    kernel = functools.partial(_ocvp_fused_kernel,
                               num_heads=num_heads, residual=residual)
    out2 = pl.pallas_call(
        kernel,
        out_shape=jax.ShapeDtypeStruct((M, Ds), inputs.dtype),
        grid=(NB,),
        in_specs=[
            pl.BlockSpec((M, Ds), const2),                          # raw inputs
            pl.BlockSpec((M, Dt), const2),                          # positional enc slab
            pl.BlockSpec(params["mlp_in_w"].shape, const2),
            pl.BlockSpec(params["mlp_in_b"].shape, const2),
            pl.BlockSpec(params["mlp_out_w"].shape, const2),
            pl.BlockSpec(params["mlp_out_b"].shape, const2),
            pl.BlockSpec((2, M, 1), const3),                        # row group ids
            pl.BlockSpec((2, 1, M), const3),                        # col group ids
            pl.BlockSpec((1,) + params["wqkv"].shape[1:], perblk),  # per-block weights
            pl.BlockSpec((1,) + params["wo"].shape[1:], perblk),
            pl.BlockSpec((1,) + params["w1"].shape[1:], perblk),
            pl.BlockSpec((1,) + params["w2"].shape[1:], perblk),
            pl.BlockSpec((1,) + params["vec"].shape[1:], perblk),
            pl.BlockSpec((1,) + params["b1"].shape[1:], perblk),
        ],
        out_specs=pl.BlockSpec((M, Ds), const2),
        scratch_shapes=[pltpu.VMEM((M, Dt), jnp.float32)],          # resident activation
        compiler_params=pltpu.CompilerParams(dimension_semantics=("arbitrary",)),
    )(x2, pe_slab, params["mlp_in_w"], params["mlp_in_b"],
      params["mlp_out_w"], params["mlp_out_b"], gid_rows, gid_cols,
      params["wqkv"], params["wo"], params["w1"], params["w2"],
      params["vec"], params["b1"])
    return out2.reshape(B, T, N, Ds)


# -----------------------------------------------------------------------------
# Parameter init (deterministic, synthetic)
# -----------------------------------------------------------------------------
def sinusoidal_pe(max_len, d_model):
    pos = jnp.arange(max_len, dtype=jnp.float32)[:, None]
    div = jnp.exp(jnp.arange(0, d_model, 2, dtype=jnp.float32)
                  * (-jnp.log(10000.0) / d_model))
    return jnp.stack([jnp.sin(pos * div), jnp.cos(pos * div)],
                     axis=-1).reshape(max_len, d_model)


def _dense(key, din, dout, dtype=jnp.bfloat16):
    return (0.02 * jax.random.normal(key, (din, dout), jnp.float32)).astype(dtype)


def init_params(key, slot_dim, token_dim, hidden_dim, num_layers, input_buffer_size):
    nb = 2 * num_layers
    keys = jax.random.split(key, 6 + 9 * nb)
    params = dict(
        mlp_in_w=_dense(keys[0], slot_dim, token_dim),
        mlp_in_b=(0.02 * jax.random.normal(keys[1], (1, token_dim), jnp.float32)),
        mlp_out_w=_dense(keys[2], token_dim, slot_dim),
        mlp_out_b=(0.02 * jax.random.normal(keys[3], (1, slot_dim), jnp.float32)),
        pe=sinusoidal_pe(input_buffer_size, token_dim),
    )
    wqkv_l, wo_l, w1_l, w2_l, vec_l, b1_l = [], [], [], [], [], []
    kidx = 6
    for _ in range(nb):
        kq, kk, kv, ko, k1, k2, kb, kln, kb1 = keys[kidx:kidx + 9]
        kidx += 9
        wqkv = jnp.concatenate(
            [_dense(kq, token_dim, token_dim, jnp.float32),
             _dense(kk, token_dim, token_dim, jnp.float32),
             _dense(kv, token_dim, token_dim, jnp.float32)], axis=1).astype(jnp.bfloat16)
        ln = 0.05 * jax.random.normal(kln, (4, token_dim), jnp.float32)
        ln_rows = jnp.stack([1.0 + ln[0], ln[1], 1.0 + ln[2], ln[3]], axis=0)
        bias_rows = 0.02 * jax.random.normal(kb, (5, token_dim), jnp.float32)
        # packed rows: [ln1_g, ln1_b, ln2_g, ln2_b, bq, bk, bv, bo, b2]
        vec = jnp.concatenate([ln_rows, bias_rows], axis=0).astype(jnp.float32)
        wqkv_l.append(wqkv)
        wo_l.append(_dense(ko, token_dim, token_dim))
        w1_l.append(_dense(k1, token_dim, hidden_dim))
        w2_l.append(_dense(k2, hidden_dim, token_dim))
        vec_l.append(vec)
        b1_l.append(0.02 * jax.random.normal(kb1, (1, hidden_dim), jnp.float32))
    params.update(
        wqkv=jnp.stack(wqkv_l), wo=jnp.stack(wo_l), w1=jnp.stack(w1_l),
        w2=jnp.stack(w2_l), vec=jnp.stack(vec_l), b1=jnp.stack(b1_l))
    return params


# -----------------------------------------------------------------------------
# Pure-JAX reference (same math, f32 everywhere) for correctness validation
# -----------------------------------------------------------------------------
def _ref_forward(inputs, params, *, num_heads, residual=False):
    B, T, N, Ds = inputs.shape
    Dt = params["mlp_in_w"].shape[1]
    H, hd = num_heads, Dt // num_heads
    f32 = lambda a: jnp.asarray(a, jnp.float32)

    x = inputs.reshape(-1, Ds) @ f32(params["mlp_in_w"]) + params["mlp_in_b"]
    x = x.reshape(B, T, N, Dt) + params["pe"][None, :T, None, :]

    def block(seqs, idx):                      # seqs: (G, L, Dt)
        wqkv, wo = f32(params["wqkv"][idx]), f32(params["wo"][idx])
        w1, w2 = f32(params["w1"][idx]), f32(params["w2"][idx])
        vec, b1 = params["vec"][idx], params["b1"][idx]
        ln1_g, ln1_b, ln2_g, ln2_b = vec[0], vec[1], vec[2], vec[3]
        bq, bk, bv, bo, b2 = vec[4], vec[5], vec[6], vec[7], vec[8]
        G, L, _ = seqs.shape
        z = _layernorm(seqs, ln1_g, ln1_b)
        qkv = z @ wqkv
        q = (qkv[..., :Dt] + bq) / jnp.sqrt(float(hd))
        k = qkv[..., Dt:2 * Dt] + bk
        v = qkv[..., 2 * Dt:] + bv
        qh = q.reshape(G, L, H, hd).transpose(0, 2, 1, 3)
        kh = k.reshape(G, L, H, hd).transpose(0, 2, 1, 3)
        vh = v.reshape(G, L, H, hd).transpose(0, 2, 1, 3)
        s = jnp.einsum('ghld,ghmd->ghlm', qh, kh)
        p = jax.nn.softmax(s, axis=-1)
        oh = jnp.einsum('ghlm,ghmd->ghld', p, vh)
        o = oh.transpose(0, 2, 1, 3).reshape(G, L, Dt)
        y = seqs + o @ wo + bo
        z2 = _layernorm(y, ln2_g, ln2_b)
        h1 = jax.nn.gelu(z2 @ w1 + b1, approximate=True)
        return y + h1 @ w2 + b2

    num_layers = params["wqkv"].shape[0] // 2
    for l in range(num_layers):
        x = block(x.reshape(B * T, N, Dt), 2 * l).reshape(B, T, N, Dt)
        xt = x.transpose(0, 2, 1, 3).reshape(B * N, T, Dt)
        xt = block(xt, 2 * l + 1).reshape(B, N, T, Dt)
        x = xt.transpose(0, 2, 1, 3)

    out = x.reshape(-1, Dt) @ f32(params["mlp_out_w"]) + params["mlp_out_b"]
    out = out.reshape(B, T, N, Ds)
    return out + inputs if residual else out


# -----------------------------------------------------------------------------
if __name__ == "__main__":
    # (B, num_imgs, num_slots, slot_dim) — small but representative shapes
    B, num_imgs, num_slots = 2, 4, 6
    slot_dim, token_dim, hidden_dim = 32, 64, 128
    num_layers, n_heads, input_buffer_size = 2, 4, 5

    key = jax.random.PRNGKey(0)
    pkey, xkey = jax.random.split(key)
    params = init_params(pkey, slot_dim, token_dim, hidden_dim,
                         num_layers, input_buffer_size)
    inputs = jax.random.normal(xkey, (B, num_imgs, num_slots, slot_dim), jnp.float32)

    fwd = jax.jit(functools.partial(ocvp_seq_forward,
                                    num_heads=n_heads, residual=False))
    out = fwd(inputs, params)
    jax.block_until_ready(out)

    ref = _ref_forward(inputs, params, num_heads=n_heads, residual=False)
    err = float(jnp.max(jnp.abs(out - ref)))

    assert out.shape == (B, num_imgs, num_slots, slot_dim)
    assert bool(jnp.all(jnp.isfinite(out)))
    assert err < 5e-2, f"max abs err vs reference = {err}"
    print("KERNEL_OK")
</pallas_src>

<mosaic_0001>
module attributes {stable_mosaic.version = 11 : i64} {
  func.func @_ocvp_fused_kernel(%arg0: i32, %arg1: memref<48x32xf32, #tpu.memory_space<vmem>>, %arg2: memref<48x64xf32, #tpu.memory_space<vmem>>, %arg3: memref<32x64xbf16, #tpu.memory_space<vmem>>, %arg4: memref<1x64xf32, #tpu.memory_space<vmem>>, %arg5: memref<64x32xbf16, #tpu.memory_space<vmem>>, %arg6: memref<1x32xf32, #tpu.memory_space<vmem>>, %arg7: memref<2x48x1xi32, #tpu.memory_space<vmem>>, %arg8: memref<2x1x48xi32, #tpu.memory_space<vmem>>, %arg9: memref<1x64x192xbf16, #tpu.memory_space<vmem>>, %arg10: memref<1x64x64xbf16, #tpu.memory_space<vmem>>, %arg11: memref<1x64x128xbf16, #tpu.memory_space<vmem>>, %arg12: memref<1x128x64xbf16, #tpu.memory_space<vmem>>, %arg13: memref<1x9x64xf32, #tpu.memory_space<vmem>>, %arg14: memref<1x1x128xf32, #tpu.memory_space<vmem>>, %arg15: memref<48x32xf32, #tpu.memory_space<vmem>>, %arg16: memref<48x64xf32, #tpu.memory_space<vmem>>) attributes {dimension_semantics = [#tpu.dimension_semantics<arbitrary>], iteration_bounds = array<i64: 4>, scalar_prefetch = 0 : i64, scratch_operands = 1 : i64, tpu.core_type = #tpu.core_type<tc>, window_params = [{pipeline_mode = #tpu.pipeline_mode<synchronous>, transform_indices = @transform_0, window_bounds = array<i64: 48, 32>}, {pipeline_mode = #tpu.pipeline_mode<synchronous>, transform_indices = @transform_1, window_bounds = array<i64: 48, 64>}, {pipeline_mode = #tpu.pipeline_mode<synchronous>, transform_indices = @transform_2, window_bounds = array<i64: 32, 64>}, {pipeline_mode = #tpu.pipeline_mode<synchronous>, transform_indices = @transform_3, window_bounds = array<i64: 1, 64>}, {pipeline_mode = #tpu.pipeline_mode<synchronous>, transform_indices = @transform_4, window_bounds = array<i64: 64, 32>}, {pipeline_mode = #tpu.pipeline_mode<synchronous>, transform_indices = @transform_5, window_bounds = array<i64: 1, 32>}, {pipeline_mode = #tpu.pipeline_mode<synchronous>, transform_indices = @transform_6, window_bounds = array<i64: 2, 48, 1>}, {pipeline_mode = #tpu.pipeline_mode<synchronous>, transform_indices = @transform_7, window_bounds = array<i64: 2, 1, 48>}, {transform_indices = @transform_8, window_bounds = array<i64: 1, 64, 192>}, {transform_indices = @transform_9, window_bounds = array<i64: 1, 64, 64>}, {transform_indices = @transform_10, window_bounds = array<i64: 1, 64, 128>}, {transform_indices = @transform_11, window_bounds = array<i64: 1, 128, 64>}, {transform_indices = @transform_12, window_bounds = array<i64: 1, 9, 64>}, {transform_indices = @transform_13, window_bounds = array<i64: 1, 1, 128>}, {pipeline_mode = #tpu.pipeline_mode<synchronous>, transform_indices = @transform_14, window_bounds = array<i64: 48, 32>}]} {
    %c0_i32 = arith.constant 0 : i32
    %0 = arith.cmpi eq, %arg0, %c0_i32 : i32
    %1 = arith.extui %0 : i1 to i32
    %c0_i32_0 = arith.constant 0 : i32
    %2 = arith.cmpi ne, %1, %c0_i32_0 : i32
    scf.if %2 {
      %c0_71 = arith.constant 0 : index
      %c0_72 = arith.constant 0 : index
      %217 = vector.load %arg1[%c0_71, %c0_72] : memref<48x32xf32, #tpu.memory_space<vmem>>, vector<48x32xf32>
      %218 = arith.truncf %217 : vector<48x32xf32> to vector<48x32xbf16>
      %c0_73 = arith.constant 0 : index
      %c0_74 = arith.constant 0 : index
      %219 = vector.load %arg3[%c0_73, %c0_74] : memref<32x64xbf16, #tpu.memory_space<vmem>>, vector<32x64xbf16>
      %cst_75 = arith.constant dense<0.000000e+00> : vector<48x64xf32>
      %220 = tpu.matmul %218, %219, %cst_75 {dimension_numbers = #tpu.dot_dimension_numbers<[1], [0], [0], [1], [0, 0, 1, 1], [], []>} : vector<48x32xbf16>, vector<32x64xbf16>, vector<48x64xf32> -> vector<48x64xf32>
      %c0_76 = arith.constant 0 : index
      %c0_77 = arith.constant 0 : index
      %221 = vector.load %arg4[%c0_76, %c0_77] : memref<1x64xf32, #tpu.memory_space<vmem>>, vector<1x64xf32>
      %222 = vector.broadcast %221 : vector<1x64xf32> to vector<48x64xf32>
      %223 = arith.addf %220, %222 : vector<48x64xf32>
      %c0_78 = arith.constant 0 : index
      %c0_79 = arith.constant 0 : index
      %224 = vector.load %arg2[%c0_78, %c0_79] : memref<48x64xf32, #tpu.memory_space<vmem>>, vector<48x64xf32>
      %225 = arith.addf %223, %224 : vector<48x64xf32>
      %c0_80 = arith.constant 0 : index
      %c0_81 = arith.constant 0 : index
      %226 = vector.load %arg16[%c0_80, %c0_81] : memref<48x64xf32, #tpu.memory_space<vmem>>, vector<48x64xf32>
      tpu.vector_store %arg16[%c0_80, %c0_81], %225 {strides = array<i32>} : memref<48x64xf32, #tpu.memory_space<vmem>>, vector<48x64xf32>,
    } else {
    }
    %c2_i32 = arith.constant 2 : i32
    %c0_i32_1 = arith.constant 0 : i32
    %3 = arith.cmpi eq, %c2_i32, %c0_i32_1 : i32
    %c1_i32 = arith.constant 1 : i32
    %4 = arith.select %3, %c1_i32, %c2_i32 : i32
    %5 = arith.remsi %arg0, %4 : i32
    %c0_i32_2 = arith.constant 0 : i32
    %6 = arith.cmpi ne, %5, %c0_i32_2 : i32
    %c0_i32_3 = arith.constant 0 : i32
    %7 = arith.cmpi slt, %5, %c0_i32_3 : i32
    %c0_i32_4 = arith.constant 0 : i32
    %8 = arith.cmpi slt, %4, %c0_i32_4 : i32
    %9 = arith.xori %7, %8 : i1
    %10 = arith.andi %9, %6 : i1
    %11 = arith.addi %5, %4 : i32
    %12 = arith.select %10, %11, %5 : i32
    %13 = arith.index_cast %12 : i32 to index
    %c0 = arith.constant 0 : index
    %c0_5 = arith.constant 0 : index
    %14 = vector.load %arg7[%13, %c0, %c0_5] : memref<2x48x1xi32, #tpu.memory_space<vmem>>, vector<1x48x1xi32>
    %15 = vector.shape_cast %14 : vector<1x48x1xi32> to vector<48x1xi32>
    %16 = arith.index_cast %12 : i32 to index
    %c0_6 = arith.constant 0 : index
    %c0_7 = arith.constant 0 : index
    %17 = vector.load %arg8[%16, %c0_6, %c0_7] : memref<2x1x48xi32, #tpu.memory_space<vmem>>, vector<1x1x48xi32>
    %18 = vector.shape_cast %17 : vector<1x1x48xi32> to vector<1x48xi32>
    %19 = vector.broadcast %15 : vector<48x1xi32> to vector<48x48xi32>
    %20 = vector.broadcast %18 : vector<1x48xi32> to vector<48x48xi32>
    %21 = arith.cmpi eq, %19, %20 : vector<48x48xi32>
    %cst = arith.constant 0.000000e+00 : f32
    %cst_8 = arith.constant -1.000000e+30 : f32
    %22 = vector.broadcast %cst : f32 to vector<48x48xf32>
    %23 = vector.broadcast %cst_8 : f32 to vector<48x48xf32>
    %24 = arith.select %21, %22, %23 : vector<48x48xi1>, vector<48x48xf32>
    %c0_9 = arith.constant 0 : index
    %c0_10 = arith.constant 0 : index
    %c0_11 = arith.constant 0 : index
    %25 = vector.load %arg13[%c0_9, %c0_10, %c0_11] : memref<1x9x64xf32, #tpu.memory_space<vmem>>, vector<1x9x64xf32>
    %26 = vector.shape_cast %25 : vector<1x9x64xf32> to vector<9x64xf32>
    %27 = vector.extract_strided_slice %26 {offsets = [0, 0], sizes = [1, 64], strides = [1, 1]} : vector<9x64xf32> to vector<1x64xf32>
    %28 = vector.extract_strided_slice %26 {offsets = [1, 0], sizes = [1, 64], strides = [1, 1]} : vector<9x64xf32> to vector<1x64xf32>
    %29 = vector.extract_strided_slice %26 {offsets = [2, 0], sizes = [1, 64], strides = [1, 1]} : vector<9x64xf32> to vector<1x64xf32>
    %30 = vector.extract_strided_slice %26 {offsets = [3, 0], sizes = [1, 64], strides = [1, 1]} : vector<9x64xf32> to vector<1x64xf32>
    %31 = vector.extract_strided_slice %26 {offsets = [4, 0], sizes = [1, 64], strides = [1, 1]} : vector<9x64xf32> to vector<1x64xf32>
    %32 = vector.extract_strided_slice %26 {offsets = [5, 0], sizes = [1, 64], strides = [1, 1]} : vector<9x64xf32> to vector<1x64xf32>
    %33 = vector.extract_strided_slice %26 {offsets = [6, 0], sizes = [1, 64], strides = [1, 1]} : vector<9x64xf32> to vector<1x64xf32>
    %34 = vector.extract_strided_slice %26 {offsets = [7, 0], sizes = [1, 64], strides = [1, 1]} : vector<9x64xf32> to vector<1x64xf32>
    %35 = vector.extract_strided_slice %26 {offsets = [8, 0], sizes = [1, 64], strides = [1, 1]} : vector<9x64xf32> to vector<1x64xf32>
    %c0_12 = arith.constant 0 : index
    %c0_13 = arith.constant 0 : index
    %36 = vector.load %arg16[%c0_12, %c0_13] : memref<48x64xf32, #tpu.memory_space<vmem>>, vector<48x64xf32>
    %cst_14 = arith.constant dense<0.000000e+00> : vector<48xf32>
    %37 = vector.multi_reduction <add>, %36, %cst_14 [1] : vector<48x64xf32> to vector<48xf32>
    %38 = vector.shape_cast %37 : vector<48xf32> to vector<48x1xf32>
    %cst_15 = arith.constant 6.400000e+01 : f32
    %39 = vector.broadcast %cst_15 : f32 to vector<48x1xf32>
    %40 = arith.divf %38, %39 : vector<48x1xf32>
    %41 = vector.broadcast %40 : vector<48x1xf32> to vector<48x64xf32>
    %42 = arith.subf %36, %41 : vector<48x64xf32>
    %43 = arith.mulf %42, %42 : vector<48x64xf32>
    %cst_16 = arith.constant dense<0.000000e+00> : vector<48xf32>
    %44 = vector.multi_reduction <add>, %43, %cst_16 [1] : vector<48x64xf32> to vector<48xf32>
    %45 = vector.shape_cast %44 : vector<48xf32> to vector<48x1xf32>
    %cst_17 = arith.constant 6.400000e+01 : f32
    %46 = vector.broadcast %cst_17 : f32 to vector<48x1xf32>
    %47 = arith.divf %45, %46 : vector<48x1xf32>
    %48 = vector.broadcast %40 : vector<48x1xf32> to vector<48x64xf32>
    %49 = arith.subf %36, %48 : vector<48x64xf32>
    %cst_18 = arith.constant 9.99999974E-6 : f32
    %50 = vector.broadcast %cst_18 : f32 to vector<48x1xf32>
    %51 = arith.addf %47, %50 : vector<48x1xf32>
    %52 = math.rsqrt %51 : vector<48x1xf32>
    %53 = vector.broadcast %52 : vector<48x1xf32> to vector<48x64xf32>
    %54 = arith.mulf %49, %53 : vector<48x64xf32>
    %55 = vector.broadcast %27 : vector<1x64xf32> to vector<48x64xf32>
    %56 = arith.mulf %54, %55 : vector<48x64xf32>
    %57 = vector.broadcast %28 : vector<1x64xf32> to vector<48x64xf32>
    %58 = arith.addf %56, %57 : vector<48x64xf32>
    %59 = arith.truncf %58 : vector<48x64xf32> to vector<48x64xbf16>
    %c0_19 = arith.constant 0 : index
    %c0_20 = arith.constant 0 : index
    %c0_21 = arith.constant 0 : index
    %60 = vector.load %arg9[%c0_19, %c0_20, %c0_21] : memref<1x64x192xbf16, #tpu.memory_space<vmem>>, vector<1x64x192xbf16>
    %61 = vector.shape_cast %60 : vector<1x64x192xbf16> to vector<64x192xbf16>
    %cst_22 = arith.constant dense<0.000000e+00> : vector<48x192xf32>
    %62 = tpu.matmul %59, %61, %cst_22 {dimension_numbers = #tpu.dot_dimension_numbers<[1], [0], [0], [1], [0, 0, 1, 1], [], []>} : vector<48x64xbf16>, vector<64x192xbf16>, vector<48x192xf32> -> vector<48x192xf32>
    %63 = vector.extract_strided_slice %62 {offsets = [0, 0], sizes = [48, 64], strides = [1, 1]} : vector<48x192xf32> to vector<48x64xf32>
    %64 = vector.broadcast %31 : vector<1x64xf32> to vector<48x64xf32>
    %65 = arith.addf %63, %64 : vector<48x64xf32>
    %cst_23 = arith.constant 2.500000e-01 : f32
    %66 = vector.broadcast %cst_23 : f32 to vector<48x64xf32>
    %67 = arith.mulf %65, %66 : vector<48x64xf32>
    %68 = arith.truncf %67 : vector<48x64xf32> to vector<48x64xbf16>
    %69 = vector.extract_strided_slice %62 {offsets = [0, 64], sizes = [48, 64], strides = [1, 1]} : vector<48x192xf32> to vector<48x64xf32>
    %70 = vector.broadcast %32 : vector<1x64xf32> to vector<48x64xf32>
    %71 = arith.addf %69, %70 : vector<48x64xf32>
    %72 = arith.truncf %71 : vector<48x64xf32> to vector<48x64xbf16>
    %73 = vector.extract_strided_slice %62 {offsets = [0, 128], sizes = [48, 64], strides = [1, 1]} : vector<48x192xf32> to vector<48x64xf32>
    %74 = vector.broadcast %33 : vector<1x64xf32> to vector<48x64xf32>
    %75 = arith.addf %73, %74 : vector<48x64xf32>
    %76 = arith.truncf %75 : vector<48x64xf32> to vector<48x64xbf16>
    %c0_24 = arith.constant 0 : index
    %c0_25 = arith.constant 0 : index
    %c0_26 = arith.constant 0 : index
    %77 = vector.load %arg10[%c0_24, %c0_25, %c0_26] : memref<1x64x64xbf16, #tpu.memory_space<vmem>>, vector<1x64x64xbf16>
    %78 = vector.shape_cast %77 : vector<1x64x64xbf16> to vector<64x64xbf16>
    %cst_27 = arith.constant 0.000000e+00 : f32
    %79 = vector.broadcast %cst_27 : f32 to vector<48x64xf32>
    %80 = vector.extract_strided_slice %68 {offsets = [0, 0], sizes = [48, 16], strides = [1, 1]} : vector<48x64xbf16> to vector<48x16xbf16>
    %81 = vector.extract_strided_slice %72 {offsets = [0, 0], sizes = [48, 16], strides = [1, 1]} : vector<48x64xbf16> to vector<48x16xbf16>
    %cst_28 = arith.constant dense<0.000000e+00> : vector<48x48xf32>
    %82 = tpu.matmul %80, %81, %cst_28 {dimension_numbers = #tpu.dot_dimension_numbers<[1], [1], [0], [0], [0, 0, 1, 0], [], []>} : vector<48x16xbf16>, vector<48x16xbf16>, vector<48x48xf32> -> vector<48x48xf32>
    %83 = arith.addf %82, %24 : vector<48x48xf32>
    %cst_29 = arith.constant dense<0xFF800000> : vector<48xf32>
    %84 = vector.multi_reduction <maximumf>, %83, %cst_29 [1] : vector<48x48xf32> to vector<48xf32>
    %85 = vector.shape_cast %84 : vector<48xf32> to vector<48x1xf32>
    %86 = vector.broadcast %85 : vector<48x1xf32> to vector<48x48xf32>
    %87 = arith.subf %83, %86 : vector<48x48xf32>
    %88 = math.exp %87 : vector<48x48xf32>
    %cst_30 = arith.constant dense<0.000000e+00> : vector<48xf32>
    %89 = vector.multi_reduction <add>, %88, %cst_30 [1] : vector<48x48xf32> to vector<48xf32>
    %90 = vector.shape_cast %89 : vector<48xf32> to vector<48x1xf32>
    %91 = vector.broadcast %90 : vector<48x1xf32> to vector<48x48xf32>
    %92 = arith.divf %88, %91 : vector<48x48xf32>
    %93 = vector.extract_strided_slice %76 {offsets = [0, 0], sizes = [48, 16], strides = [1, 1]} : vector<48x64xbf16> to vector<48x16xbf16>
    %94 = vector.extract_strided_slice %78 {offsets = [0, 0], sizes = [16, 64], strides = [1, 1]} : vector<64x64xbf16> to vector<16x64xbf16>
    %cst_31 = arith.constant dense<0.000000e+00> : vector<48x64xf32>
    %95 = tpu.matmul %93, %94, %cst_31 {dimension_numbers = #tpu.dot_dimension_numbers<[1], [0], [0], [1], [0, 0, 1, 1], [], []>} : vector<48x16xbf16>, vector<16x64xbf16>, vector<48x64xf32> -> vector<48x64xf32>
    %96 = arith.truncf %92 : vector<48x48xf32> to vector<48x48xbf16>
    %97 = arith.truncf %95 : vector<48x64xf32> to vector<48x64xbf16>
    %cst_32 = arith.constant dense<0.000000e+00> : vector<48x64xf32>
    %98 = tpu.matmul %96, %97, %cst_32 {dimension_numbers = #tpu.dot_dimension_numbers<[1], [0], [0], [1], [0, 0, 1, 1], [], []>} : vector<48x48xbf16>, vector<48x64xbf16>, vector<48x64xf32> -> vector<48x64xf32>
    %99 = arith.addf %79, %98 : vector<48x64xf32>
    %100 = vector.extract_strided_slice %68 {offsets = [0, 16], sizes = [48, 16], strides = [1, 1]} : vector<48x64xbf16> to vector<48x16xbf16>
    %101 = vector.extract_strided_slice %72 {offsets = [0, 16], sizes = [48, 16], strides = [1, 1]} : vector<48x64xbf16> to vector<48x16xbf16>
    %cst_33 = arith.constant dense<0.000000e+00> : vector<48x48xf32>
    %102 = tpu.matmul %100, %101, %cst_33 {dimension_numbers = #tpu.dot_dimension_numbers<[1], [1], [0], [0], [0, 0, 1, 0], [], []>} : vector<48x16xbf16>, vector<48x16xbf16>, vector<48x48xf32> -> vector<48x48xf32>
    %103 = arith.addf %102, %24 : vector<48x48xf32>
    %cst_34 = arith.constant dense<0xFF800000> : vector<48xf32>
    %104 = vector.multi_reduction <maximumf>, %103, %cst_34 [1] : vector<48x48xf32> to vector<48xf32>
    %105 = vector.shape_cast %104 : vector<48xf32> to vector<48x1xf32>
    %106 = vector.broadcast %105 : vector<48x1xf32> to vector<48x48xf32>
    %107 = arith.subf %103, %106 : vector<48x48xf32>
    %108 = math.exp %107 : vector<48x48xf32>
    %cst_35 = arith.constant dense<0.000000e+00> : vector<48xf32>
    %109 = vector.multi_reduction <add>, %108, %cst_35 [1] : vector<48x48xf32> to vector<48xf32>
    %110 = vector.shape_cast %109 : vector<48xf32> to vector<48x1xf32>
    %111 = vector.broadcast %110 : vector<48x1xf32> to vector<48x48xf32>
    %112 = arith.divf %108, %111 : vector<48x48xf32>
    %113 = vector.extract_strided_slice %76 {offsets = [0, 16], sizes = [48, 16], strides = [1, 1]} : vector<48x64xbf16> to vector<48x16xbf16>
    %114 = vector.extract_strided_slice %78 {offsets = [16, 0], sizes = [16, 64], strides = [1, 1]} : vector<64x64xbf16> to vector<16x64xbf16>
    %cst_36 = arith.constant dense<0.000000e+00> : vector<48x64xf32>
    %115 = tpu.matmul %113, %114, %cst_36 {dimension_numbers = #tpu.dot_dimension_numbers<[1], [0], [0], [1], [0, 0, 1, 1], [], []>} : vector<48x16xbf16>, vector<16x64xbf16>, vector<48x64xf32> -> vector<48x64xf32>
    %116 = arith.truncf %112 : vector<48x48xf32> to vector<48x48xbf16>
    %117 = arith.truncf %115 : vector<48x64xf32> to vector<48x64xbf16>
    %cst_37 = arith.constant dense<0.000000e+00> : vector<48x64xf32>
    %118 = tpu.matmul %116, %117, %cst_37 {dimension_numbers = #tpu.dot_dimension_numbers<[1], [0], [0], [1], [0, 0, 1, 1], [], []>} : vector<48x48xbf16>, vector<48x64xbf16>, vector<48x64xf32> -> vector<48x64xf32>
    %119 = arith.addf %99, %118 : vector<48x64xf32>
    %120 = vector.extract_strided_slice %68 {offsets = [0, 32], sizes = [48, 16], strides = [1, 1]} : vector<48x64xbf16> to vector<48x16xbf16>
    %121 = vector.extract_strided_slice %72 {offsets = [0, 32], sizes = [48, 16], strides = [1, 1]} : vector<48x64xbf16> to vector<48x16xbf16>
    %cst_38 = arith.constant dense<0.000000e+00> : vector<48x48xf32>
    %122 = tpu.matmul %120, %121, %cst_38 {dimension_numbers = #tpu.dot_dimension_numbers<[1], [1], [0], [0], [0, 0, 1, 0], [], []>} : vector<48x16xbf16>, vector<48x16xbf16>, vector<48x48xf32> -> vector<48x48xf32>
    %123 = arith.addf %122, %24 : vector<48x48xf32>
    %cst_39 = arith.constant dense<0xFF800000> : vector<48xf32>
    %124 = vector.multi_reduction <maximumf>, %123, %cst_39 [1] : vector<48x48xf32> to vector<48xf32>
    %125 = vector.shape_cast %124 : vector<48xf32> to vector<48x1xf32>
    %126 = vector.broadcast %125 : vector<48x1xf32> to vector<48x48xf32>
    %127 = arith.subf %123, %126 : vector<48x48xf32>
    %128 = math.exp %127 : vector<48x48xf32>
    %cst_40 = arith.constant dense<0.000000e+00> : vector<48xf32>
    %129 = vector.multi_reduction <add>, %128, %cst_40 [1] : vector<48x48xf32> to vector<48xf32>
    %130 = vector.shape_cast %129 : vector<48xf32> to vector<48x1xf32>
    %131 = vector.broadcast %130 : vector<48x1xf32> to vector<48x48xf32>
    %132 = arith.divf %128, %131 : vector<48x48xf32>
    %133 = vector.extract_strided_slice %76 {offsets = [0, 32], sizes = [48, 16], strides = [1, 1]} : vector<48x64xbf16> to vector<48x16xbf16>
    %134 = vector.extract_strided_slice %78 {offsets = [32, 0], sizes = [16, 64], strides = [1, 1]} : vector<64x64xbf16> to vector<16x64xbf16>
    %cst_41 = arith.constant dense<0.000000e+00> : vector<48x64xf32>
    %135 = tpu.matmul %133, %134, %cst_41 {dimension_numbers = #tpu.dot_dimension_numbers<[1], [0], [0], [1], [0, 0, 1, 1], [], []>} : vector<48x16xbf16>, vector<16x64xbf16>, vector<48x64xf32> -> vector<48x64xf32>
    %136 = arith.truncf %132 : vector<48x48xf32> to vector<48x48xbf16>
    %137 = arith.truncf %135 : vector<48x64xf32> to vector<48x64xbf16>
    %cst_42 = arith.constant dense<0.000000e+00> : vector<48x64xf32>
    %138 = tpu.matmul %136, %137, %cst_42 {dimension_numbers = #tpu.dot_dimension_numbers<[1], [0], [0], [1], [0, 0, 1, 1], [], []>} : vector<48x48xbf16>, vector<48x64xbf16>, vector<48x64xf32> -> vector<48x64xf32>
    %139 = arith.addf %119, %138 : vector<48x64xf32>
    %140 = vector.extract_strided_slice %68 {offsets = [0, 48], sizes = [48, 16], strides = [1, 1]} : vector<48x64xbf16> to vector<48x16xbf16>
    %141 = vector.extract_strided_slice %72 {offsets = [0, 48], sizes = [48, 16], strides = [1, 1]} : vector<48x64xbf16> to vector<48x16xbf16>
    %cst_43 = arith.constant dense<0.000000e+00> : vector<48x48xf32>
    %142 = tpu.matmul %140, %141, %cst_43 {dimension_numbers = #tpu.dot_dimension_numbers<[1], [1], [0], [0], [0, 0, 1, 0], [], []>} : vector<48x16xbf16>, vector<48x16xbf16>, vector<48x48xf32> -> vector<48x48xf32>
    %143 = arith.addf %142, %24 : vector<48x48xf32>
    %cst_44 = arith.constant dense<0xFF800000> : vector<48xf32>
    %144 = vector.multi_reduction <maximumf>, %143, %cst_44 [1] : vector<48x48xf32> to vector<48xf32>
    %145 = vector.shape_cast %144 : vector<48xf32> to vector<48x1xf32>
    %146 = vector.broadcast %145 : vector<48x1xf32> to vector<48x48xf32>
    %147 = arith.subf %143, %146 : vector<48x48xf32>
    %148 = math.exp %147 : vector<48x48xf32>
    %cst_45 = arith.constant dense<0.000000e+00> : vector<48xf32>
    %149 = vector.multi_reduction <add>, %148, %cst_45 [1] : vector<48x48xf32> to vector<48xf32>
    %150 = vector.shape_cast %149 : vector<48xf32> to vector<48x1xf32>
    %151 = vector.broadcast %150 : vector<48x1xf32> to vector<48x48xf32>
    %152 = arith.divf %148, %151 : vector<48x48xf32>
    %153 = vector.extract_strided_slice %76 {offsets = [0, 48], sizes = [48, 16], strides = [1, 1]} : vector<48x64xbf16> to vector<48x16xbf16>
    %154 = vector.extract_strided_slice %78 {offsets = [48, 0], sizes = [16, 64], strides = [1, 1]} : vector<64x64xbf16> to vector<16x64xbf16>
    %cst_46 = arith.constant dense<0.000000e+00> : vector<48x64xf32>
    %155 = tpu.matmul %153, %154, %cst_46 {dimension_numbers = #tpu.dot_dimension_numbers<[1], [0], [0], [1], [0, 0, 1, 1], [], []>} : vector<48x16xbf16>, vector<16x64xbf16>, vector<48x64xf32> -> vector<48x64xf32>
    %156 = arith.truncf %152 : vector<48x48xf32> to vector<48x48xbf16>
    %157 = arith.truncf %155 : vector<48x64xf32> to vector<48x64xbf16>
    %cst_47 = arith.constant dense<0.000000e+00> : vector<48x64xf32>
    %158 = tpu.matmul %156, %157, %cst_47 {dimension_numbers = #tpu.dot_dimension_numbers<[1], [0], [0], [1], [0, 0, 1, 1], [], []>} : vector<48x48xbf16>, vector<48x64xbf16>, vector<48x64xf32> -> vector<48x64xf32>
    %159 = arith.addf %139, %158 : vector<48x64xf32>
    %160 = arith.addf %36, %159 : vector<48x64xf32>
    %161 = vector.broadcast %34 : vector<1x64xf32> to vector<48x64xf32>
    %162 = arith.addf %160, %161 : vector<48x64xf32>
    %cst_48 = arith.constant dense<0.000000e+00> : vector<48xf32>
    %163 = vector.multi_reduction <add>, %162, %cst_48 [1] : vector<48x64xf32> to vector<48xf32>
    %164 = vector.shape_cast %163 : vector<48xf32> to vector<48x1xf32>
    %cst_49 = arith.constant 6.400000e+01 : f32
    %165 = vector.broadcast %cst_49 : f32 to vector<48x1xf32>
    %166 = arith.divf %164, %165 : vector<48x1xf32>
    %167 = vector.broadcast %166 : vector<48x1xf32> to vector<48x64xf32>
    %168 = arith.subf %162, %167 : vector<48x64xf32>
    %169 = arith.mulf %168, %168 : vector<48x64xf32>
    %cst_50 = arith.constant dense<0.000000e+00> : vector<48xf32>
    %170 = vector.multi_reduction <add>, %169, %cst_50 [1] : vector<48x64xf32> to vector<48xf32>
    %171 = vector.shape_cast %170 : vector<48xf32> to vector<48x1xf32>
    %cst_51 = arith.constant 6.400000e+01 : f32
    %172 = vector.broadcast %cst_51 : f32 to vector<48x1xf32>
    %173 = arith.divf %171, %172 : vector<48x1xf32>
    %174 = vector.broadcast %166 : vector<48x1xf32> to vector<48x64xf32>
    %175 = arith.subf %162, %174 : vector<48x64xf32>
    %cst_52 = arith.constant 9.99999974E-6 : f32
    %176 = vector.broadcast %cst_52 : f32 to vector<48x1xf32>
    %177 = arith.addf %173, %176 : vector<48x1xf32>
    %178 = math.rsqrt %177 : vector<48x1xf32>
    %179 = vector.broadcast %178 : vector<48x1xf32> to vector<48x64xf32>
    %180 = arith.mulf %175, %179 : vector<48x64xf32>
    %181 = vector.broadcast %29 : vector<1x64xf32> to vector<48x64xf32>
    %182 = arith.mulf %180, %181 : vector<48x64xf32>
    %183 = vector.broadcast %30 : vector<1x64xf32> to vector<48x64xf32>
    %184 = arith.addf %182, %183 : vector<48x64xf32>
    %185 = arith.truncf %184 : vector<48x64xf32> to vector<48x64xbf16>
    %c0_53 = arith.constant 0 : index
    %c0_54 = arith.constant 0 : index
    %c0_55 = arith.constant 0 : index
    %186 = vector.load %arg11[%c0_53, %c0_54, %c0_55] : memref<1x64x128xbf16, #tpu.memory_space<vmem>>, vector<1x64x128xbf16>
    %187 = vector.shape_cast %186 : vector<1x64x128xbf16> to vector<64x128xbf16>
    %cst_56 = arith.constant dense<0.000000e+00> : vector<48x128xf32>
    %188 = tpu.matmul %185, %187, %cst_56 {dimension_numbers = #tpu.dot_dimension_numbers<[1], [0], [0], [1], [0, 0, 1, 1], [], []>} : vector<48x64xbf16>, vector<64x128xbf16>, vector<48x128xf32> -> vector<48x128xf32>
    %c0_57 = arith.constant 0 : index
    %c0_58 = arith.constant 0 : index
    %c0_59 = arith.constant 0 : index
    %189 = vector.load %arg14[%c0_57, %c0_58, %c0_59] : memref<1x1x128xf32, #tpu.memory_space<vmem>>, vector<1x1x128xf32>
    %190 = vector.shape_cast %189 : vector<1x1x128xf32> to vector<1x128xf32>
    %191 = vector.broadcast %190 : vector<1x128xf32> to vector<48x128xf32>
    %192 = arith.addf %188, %191 : vector<48x128xf32>
    %193 = arith.mulf %192, %192 : vector<48x128xf32>
    %194 = arith.mulf %192, %193 : vector<48x128xf32>
    %cst_60 = arith.constant 4.471500e-02 : f32
    %195 = vector.broadcast %cst_60 : f32 to vector<48x128xf32>
    %196 = arith.mulf %195, %194 : vector<48x128xf32>
    %197 = arith.addf %192, %196 : vector<48x128xf32>
    %cst_61 = arith.constant 0.797884583 : f32
    %198 = vector.broadcast %cst_61 : f32 to vector<48x128xf32>
    %199 = arith.mulf %198, %197 : vector<48x128xf32>
    %200 = math.tanh %199 : vector<48x128xf32>
    %cst_62 = arith.constant 1.000000e+00 : f32
    %201 = vector.broadcast %cst_62 : f32 to vector<48x128xf32>
    %202 = arith.addf %201, %200 : vector<48x128xf32>
    %cst_63 = arith.constant 5.000000e-01 : f32
    %203 = vector.broadcast %cst_63 : f32 to vector<48x128xf32>
    %204 = arith.mulf %203, %202 : vector<48x128xf32>
    %205 = arith.mulf %192, %204 : vector<48x128xf32>
    %206 = arith.truncf %205 : vector<48x128xf32> to vector<48x128xbf16>
    %c0_64 = arith.constant 0 : index
    %c0_65 = arith.constant 0 : index
    %c0_66 = arith.constant 0 : index
    %207 = vector.load %arg12[%c0_64, %c0_65, %c0_66] : memref<1x128x64xbf16, #tpu.memory_space<vmem>>, vector<1x128x64xbf16>
    %208 = vector.shape_cast %207 : vector<1x128x64xbf16> to vector<128x64xbf16>
    %cst_67 = arith.constant dense<0.000000e+00> : vector<48x64xf32>
    %209 = tpu.matmul %206, %208, %cst_67 {dimension_numbers = #tpu.dot_dimension_numbers<[1], [0], [0], [1], [0, 0, 1, 1], [], []>} : vector<48x128xbf16>, vector<128x64xbf16>, vector<48x64xf32> -> vector<48x64xf32>
    %210 = vector.broadcast %35 : vector<1x64xf32> to vector<48x64xf32>
    %211 = arith.addf %209, %210 : vector<48x64xf32>
    %212 = arith.addf %162, %211 : vector<48x64xf32>
    %c0_68 = arith.constant 0 : index
    %c0_69 = arith.constant 0 : index
    %213 = vector.load %arg16[%c0_68, %c0_69] : memref<48x64xf32, #tpu.memory_space<vmem>>, vector<48x64xf32>
    tpu.vector_store %arg16[%c0_68, %c0_69], %212 {strides = array<i32>} : memref<48x64xf32, #tpu.memory_space<vmem>>, vector<48x64xf32>,
    %c3_i32 = arith.constant 3 : i32
    %214 = arith.cmpi eq, %arg0, %c3_i32 : i32
    %215 = arith.extui %214 : i1 to i32
    %c0_i32_70 = arith.constant 0 : i32
    %216 = arith.cmpi ne, %215, %c0_i32_70 : i32
    scf.if %216 {
      %c0_71 = arith.constant 0 : index
      %c0_72 = arith.constant 0 : index
      %217 = vector.load %arg16[%c0_71, %c0_72] : memref<48x64xf32, #tpu.memory_space<vmem>>, vector<48x64xf32>
      %218 = arith.truncf %217 : vector<48x64xf32> to vector<48x64xbf16>
      %c0_73 = arith.constant 0 : index
      %c0_74 = arith.constant 0 : index
      %219 = vector.load %arg5[%c0_73, %c0_74] : memref<64x32xbf16, #tpu.memory_space<vmem>>, vector<64x32xbf16>
      %cst_75 = arith.constant dense<0.000000e+00> : vector<48x32xf32>
      %220 = tpu.matmul %218, %219, %cst_75 {dimension_numbers = #tpu.dot_dimension_numbers<[1], [0], [0], [1], [0, 0, 1, 1], [], []>} : vector<48x64xbf16>, vector<64x32xbf16>, vector<48x32xf32> -> vector<48x32xf32>
      %c0_76 = arith.constant 0 : index
      %c0_77 = arith.constant 0 : index
      %221 = vector.load %arg6[%c0_76, %c0_77] : memref<1x32xf32, #tpu.memory_space<vmem>>, vector<1x32xf32>
      %222 = vector.broadcast %221 : vector<1x32xf32> to vector<48x32xf32>
      %223 = arith.addf %220, %222 : vector<48x32xf32>
      %c0_78 = arith.constant 0 : index
      %c0_79 = arith.constant 0 : index
      %224 = vector.load %arg15[%c0_78, %c0_79] : memref<48x32xf32, #tpu.memory_space<vmem>>, vector<48x32xf32>
      tpu.vector_store %arg15[%c0_78, %c0_79], %223 {strides = array<i32>} : memref<48x32xf32, #tpu.memory_space<vmem>>, vector<48x32xf32>,
    } else {
    }
    return
  }
  func.func @transform_0(%arg0: i32) -> (i32, i32) {
    %c0_i32 = arith.constant 0 : i32
    %c0_i32_0 = arith.constant 0 : i32
    %c0_i32_1 = arith.constant 0 : i32
    return %c0_i32, %c0_i32_0 : i32, i32
  }
  func.func @transform_1(%arg0: i32) -> (i32, i32) {
    %c0_i32 = arith.constant 0 : i32
    %c0_i32_0 = arith.constant 0 : i32
    %c0_i32_1 = arith.constant 0 : i32
    return %c0_i32, %c0_i32_0 : i32, i32
  }
  func.func @transform_2(%arg0: i32) -> (i32, i32) {
    %c0_i32 = arith.constant 0 : i32
    %c0_i32_0 = arith.constant 0 : i32
    %c0_i32_1 = arith.constant 0 : i32
    return %c0_i32, %c0_i32_0 : i32, i32
  }
  func.func @transform_3(%arg0: i32) -> (i32, i32) {
    %c0_i32 = arith.constant 0 : i32
    %c0_i32_0 = arith.constant 0 : i32
    %c0_i32_1 = arith.constant 0 : i32
    return %c0_i32, %c0_i32_0 : i32, i32
  }
  func.func @transform_4(%arg0: i32) -> (i32, i32) {
    %c0_i32 = arith.constant 0 : i32
    %c0_i32_0 = arith.constant 0 : i32
    %c0_i32_1 = arith.constant 0 : i32
    return %c0_i32, %c0_i32_0 : i32, i32
  }
  func.func @transform_5(%arg0: i32) -> (i32, i32) {
    %c0_i32 = arith.constant 0 : i32
    %c0_i32_0 = arith.constant 0 : i32
    %c0_i32_1 = arith.constant 0 : i32
    return %c0_i32, %c0_i32_0 : i32, i32
  }
  func.func @transform_6(%arg0: i32) -> (i32, i32, i32) {
    %c0_i32 = arith.constant 0 : i32
    %c0_i32_0 = arith.constant 0 : i32
    %c0_i32_1 = arith.constant 0 : i32
    %c0_i32_2 = arith.constant 0 : i32
    return %c0_i32, %c0_i32_0, %c0_i32_1 : i32, i32, i32
  }
  func.func @transform_7(%arg0: i32) -> (i32, i32, i32) {
    %c0_i32 = arith.constant 0 : i32
    %c0_i32_0 = arith.constant 0 : i32
    %c0_i32_1 = arith.constant 0 : i32
    %c0_i32_2 = arith.constant 0 : i32
    return %c0_i32, %c0_i32_0, %c0_i32_1 : i32, i32, i32
  }
  func.func @transform_8(%arg0: i32) -> (i32, i32, i32) {
    %c0_i32 = arith.constant 0 : i32
    %c0_i32_0 = arith.constant 0 : i32
    %c0_i32_1 = arith.constant 0 : i32
    return %arg0, %c0_i32, %c0_i32_0 : i32, i32, i32
  }
  func.func @transform_9(%arg0: i32) -> (i32, i32, i32) {
    %c0_i32 = arith.constant 0 : i32
    %c0_i32_0 = arith.constant 0 : i32
    %c0_i32_1 = arith.constant 0 : i32
    return %arg0, %c0_i32, %c0_i32_0 : i32, i32, i32
  }
  func.func @transform_10(%arg0: i32) -> (i32, i32, i32) {
    %c0_i32 = arith.constant 0 : i32
    %c0_i32_0 = arith.constant 0 : i32
    %c0_i32_1 = arith.constant 0 : i32
    return %arg0, %c0_i32, %c0_i32_0 : i32, i32, i32
  }
  func.func @transform_11(%arg0: i32) -> (i32, i32, i32) {
    %c0_i32 = arith.constant 0 : i32
    %c0_i32_0 = arith.constant 0 : i32
    %c0_i32_1 = arith.constant 0 : i32
    return %arg0, %c0_i32, %c0_i32_0 : i32, i32, i32
  }
  func.func @transform_12(%arg0: i32) -> (i32, i32, i32) {
    %c0_i32 = arith.constant 0 : i32
    %c0_i32_0 = arith.constant 0 : i32
    %c0_i32_1 = arith.constant 0 : i32
    return %arg0, %c0_i32, %c0_i32_0 : i32, i32, i32
  }
  func.func @transform_13(%arg0: i32) -> (i32, i32, i32) {
    %c0_i32 = arith.constant 0 : i32
    %c0_i32_0 = arith.constant 0 : i32
    %c0_i32_1 = arith.constant 0 : i32
    return %arg0, %c0_i32, %c0_i32_0 : i32, i32, i32
  }
  func.func @transform_14(%arg0: i32) -> (i32, i32) {
    %c0_i32 = arith.constant 0 : i32
    %c0_i32_0 = arith.constant 0 : i32
    %c0_i32_1 = arith.constant 0 : i32
    return %c0_i32, %c0_i32_0 : i32, i32
  }
}

</mosaic_0001>

<bundles_post_ra>
// kernel: ocvp_seq_forward.1
= control target key start
LH: loop header
LB: loop body
LE: loop exit
PB: predicated region body
PF: predicated region fallthrough
CT: control target
= control target key end

     0   :  { %s3673_s29 = smov 0   ;;  %s4511_s0 = inlined_call_operand.vmem [shape: f32[48,32], index: 0, kind: input, shape index: {}]   ;;  %s4512_s1 = inlined_call_operand.vmem [shape: f32[48,64], index: 1, kind: input, shape index: {}]   ;;  %s4513_s2 = inlined_call_operand.vmem [shape: bf16[32,64], index: 2, kind: input, shape index: {}]   ;;  %s4514_s3 = inlined_call_operand.vmem [shape: f32[1,64], index: 3, kind: input, shape index: {}]   ;;  %s4515_s4 = inlined_call_operand.vmem [shape: bf16[64,32], index: 4, kind: input, shape index: {}]   ;;  %s4516_s5 = inlined_call_operand.vmem [shape: f32[1,32], index: 5, kind: input, shape index: {}]   ;;  %s4517_s6 = inlined_call_operand.vmem [shape: s32[2,48,1], index: 6, kind: input, shape index: {}]   ;;  %s4518_s7 = inlined_call_operand.vmem [shape: s32[2,1,48], index: 7, kind: input, shape index: {}]   ;;  %s4519_s8 = inlined_call_operand.vmem [shape: bf16[4,64,192], index: 8, kind: input, shape index: {}]   ;;  %s4520_s9 = inlined_call_operand.vmem [shape: bf16[4,64,64], index: 9, kind: input, shape index: {}]   ;;  %s4521_s10 = inlined_call_operand.vmem [shape: bf16[4,64,128], index: 10, kind: input, shape index: {}]   ;;  %s4522_s11 = inlined_call_operand.vmem [shape: bf16[4,128,64], index: 11, kind: input, shape index: {}]   ;;  %s4523_s12 = inlined_call_operand.vmem [shape: f32[4,9,64], index: 12, kind: input, shape index: {}]   ;;  %s4524_s13 = inlined_call_operand.vmem [shape: f32[4,1,128], index: 13, kind: input, shape index: {}]   ;;  %s4525_s14 = inlined_call_operand.vmem [shape: f32[48,32], index: 14, kind: output, shape index: {}]  }
   0x1   :  { %4529 = sst [smem:[#allocation4_spill]] %s4515_s4 }
   0x2   :  { %4530 = sst [smem:[#allocation5_spill]] %s4516_s5 }
   0x3   :  { %4531 = sst [smem:[#allocation6_spill]] %s4519_s8 }
   0x4   :  { %4532 = sst [smem:[#allocation7_spill]] %s4525_s14 }
   0x5 LB: > { %4533 = sst [smem:[#allocation3_spill]] %s3581_s29  ;;  %s3679_s30 = sadd.s32 4294967295, %s3581_s29   ;;  %s3581_s29 = sphi %s3673_s29, %s24_s29  }
   0x6   : > { %p2869_p0 = scmp.ge.s32.totalorder %s3581_s29, 1  ;;  %p455_p1 = scmp.lt.s32.totalorder %s3581_s29, 5 }
   0x8   : > { %p456_p2 = pnand %p2869_p0, %p455_p1 }
   0x9   : > { %p519_p3 = scmp.lt.s32.totalorder (!%p456_p2), %s3679_s30, 3  ;;  %s4534_s8 = sld [smem:[#allocation6_spill]] (!%p456_p2) }
   0xa   : > { %459 = sbr.rel (%p456_p2) target bundleno = 3659 (0xe4b), region = 76  ;;  %p2880_p4 = scmp.ne.s32.totalorder (!%p456_p2), %s3679_s30, 0 }
  0x11   : > { %s3685_s15 = scalar_select %p519_p3, %s3679_s30, 3 }
  0x12   : > { %551 = sbr.rel (%p2880_p4) target bundleno = 254 (0xfe), region = 80  ;;  %v3400_v0 = vld [vmem:[%s4513_s2] sm:$0xff] (!%p2880_p4)   ;;  %v3583_v1 = vmov (!%p2880_p4), 0.0   ;;  %v3401_v2 = vld [vmem:[%s4513_s2 + $0x8] sm:$0xff] (!%p2880_p4)   ;;  %v554_v3 = vld [vmem:[%s4511_s0 + $0x10] sm:$0xff] (!%p2880_p4)  ;;  %vm3584_vm0 = vmmov (!%p2880_p4), 0  }
  0x13   : > { %s2970_s16 = sshll.u32 %s3685_s15, 6  ;;  %s2971_s17 = sshll.u32 %s3685_s15, 5  ;;  %3353 = vmatprep.subr.bf16.mxu1 (!%p2880_p4), %v3583_v1  ;;  %3069 = vmatprep.subr.bf16.mxu0 (!%p2880_p4), %v3583_v1  ;;  %v555_v4 = vld [vmem:[%s4511_s0 + $0x18] sm:$0xff] (!%p2880_p4)  ;;  %v552_v5 = vld [vmem:[%s4511_s0] sm:$0xff] (!%p2880_p4)  ;;  %v553_v6 = vld [vmem:[%s4511_s0 + $0x8] sm:$0xff] (!%p2880_p4)  ;;  %vm584_vm1 = vcmask (!%p2880_p4), 261120  }
  0x14   : > { %s3692_s20 = scalar_lea.vmem %s4534_s8, %s2970_s16  ;;  %s3697_s23 = scalar_lea.vmem %s4520_s9, %s2971_s17  ;;  %3355 = vmatpush3.bf16.msra.mxu1 (!%p2880_p4), %v3400_v0  ;;  %3070 = vmatpush3.bf16.msra.mxu0 (!%p2880_p4), %v3400_v0  ;;  %v559_v7 = vpack.c.bf16 (!%p2880_p4), %v555_v4, %v554_v3  ;;  %v558_v8 = vpack.c.bf16 (!%p2880_p4), %v553_v6, %v552_v5  ;;  %v556_v9 = vld [vmem:[%s4511_s0 + $0x20] sm:$0xff] (!%p2880_p4)  ;;  %v557_v10 = vld [vmem:[%s4511_s0 + $0x28] sm:$0xff] (!%p2880_p4)  ;;  %v653_v14 = vld [vmem:[%s4512_s1 + $0x10] sm:$0xff] (!%p2880_p4)  ;;  %vm663_vm2 = vcmask (!%p2880_p4), 523264  }
  0x15   : > { %s3702_s26 = scalar_lea.vmem %s4521_s10, %s2971_s17  ;;  %s3707_s29 = scalar_lea.vmem %s4522_s11, %s2970_s16  ;;  %3354 = vmatprep.subr.bf16.mxu1 (!%p2880_p4), %v3583_v1  ;;  %3077 = vmatprep.mubr.msk.bf16.mxu1 (!%p2880_p4), %vm3584_vm0, %v3583_v1  ;;  %v560_v11 = vpack.c.bf16 (!%p2880_p4), %v557_v10, %v556_v9  ;;  %v2881_v12 = vld [vmem:[%s4514_s3] ss:$0 sm:$0xff] (!%p2880_p4)  ;;  %v654_v22 = vld [vmem:[%s4512_s1 + $0x18] sm:$0xff] (!%p2880_p4)  ;;  %v652_v24 = vld [vmem:[%s4512_s1 + $0x8] sm:$0xff] (!%p2880_p4) }
  0x16   : > { %s2974_s14 = sshll.u32 %s3685_s15, 4  ;;  %s546_s19 = scalar_lea.vmem %s4524_s13, %s3685_s15  ;;  %3071 = vmatprep.subr.bf16.mxu0 (!%p2880_p4), %v3583_v1  ;;  %3073 = vmatprep.mubr.msk.bf16.mxu0 (!%p2880_p4), %vm3584_vm0, %v3583_v1  ;;  %v651_v16 = vld [vmem:[%s4512_s1] sm:$0xff] (!%p2880_p4)  ;;  %v656_v38 = vld [vmem:[%s4512_s1 + $0x28] sm:$0xff] (!%p2880_p4) }
  0x17   : > { %s3717_s21 = scalar_lea.vmem %s4523_s12, %s2974_s14  ;;  %v655_v34 = vld [vmem:[%s4512_s1 + $0x20] sm:$0xff] (!%p2880_p4) }
  0x18   : > { %3356 = vmatpush3.bf16.msra.mxu1 (!%p2880_p4), %v3401_v2  ;;  %3072 = vmatpush3.bf16.msra.mxu0 (!%p2880_p4), %v3401_v2 }
  0x1b   : > { %3078 = vmatmul.mubr.msk.bf16.vlgmr.msra.gmra.mrb[0].mxu1 %vm584_vm1, %v559_v7  ;;  %3074 = vmatmul.mubr.msk.bf16.vlgmr.msra.gmra.mrb[0].mxu0 %vm584_vm1, %v558_v8 }
  0x1c   : > { %3081 = vmatprep.mubr.msk.bf16.mxu1 %vm3584_vm0, %v3583_v1 }
  0x23   : > { %3082 = vmatmul.mubr.msk.bf16.gmra.mrb[4].mxu1 %vm584_vm1, %v560_v11 }
  0xee   : > { %v636_v13 = vpop.f32.mrb[0].mxu1  ;;  %v628_v15 = vpop.f32.mrb[0].mxu0 }
  0xef   : > { %v637_v17 = vadd.f32 %v2881_v12, %v636_v13  ;;  %v3079_v18 = vpop.f32.mrb[1].mxu1  ;;  %v629_v19 = vadd.f32 %v2881_v12, %v628_v15  ;;  %v3075_v20 = vpop.f32.mrb[1].mxu0 }
  0xf0   : > { %v639_v21 = vpop.f32.mrb[2].mxu1  ;;  %v631_v23 = vpop.f32.mrb[2].mxu0 }
  0xf1   : > { %v659_v25 = vadd.f32 %v653_v14, %v637_v17  ;;  %v640_v26 = vadd.f32 %v2881_v12, %v639_v21  ;;  %v3080_v27 = vpop.f32.mrb[3].mxu1  ;;  %v657_v28 = vadd.f32 %v651_v16, %v629_v19  ;;  %v632_v29 = vadd.f32 %v2881_v12, %v631_v23  ;;  %v3076_v30 = vpop.f32.mrb[3].mxu0 }
  0xf3   : > { %666 = vst.msk [vmem:[#allocation2 + $0x10] sm:$0xff] %vm663_vm2, %v659_v25  ;;  %v660_v31 = vadd.f32 %v654_v22, %v640_v26  ;;  %664 = vst.msk [vmem:[#allocation2] sm:$0xff] %vm663_vm2, %v657_v28  ;;  %v658_v32 = vadd.f32 %v652_v24, %v632_v29 }
  0xf5   : > { %667 = vst.msk [vmem:[#allocation2 + $0x18] sm:$0xff] %vm663_vm2, %v660_v31  ;;  %665 = vst.msk [vmem:[#allocation2 + $0x8] sm:$0xff] %vm663_vm2, %v658_v32 }
  0xf6   : > { %v644_v33 = vpop.f32.mrb[4].mxu1 }
  0xf7   : > { %v645_v35 = vadd.f32 %v2881_v12, %v644_v33  ;;  %v3083_v36 = vpop.f32.mrb[5].mxu1 }
  0xf8   : > { %v647_v37 = vpop.f32.mrb[6].mxu1 }
  0xf9   : > { %v661_v39 = vadd.f32 %v655_v34, %v645_v35  ;;  %v648_v40 = vadd.f32 %v2881_v12, %v647_v37  ;;  %v3084_v41 = vpop.f32.mrb[7].mxu1 }
  0xfb   : > { %668 = vst.msk [vmem:[#allocation2 + $0x20] sm:$0xff] %vm663_vm2, %v661_v39  ;;  %v662_v42 = vadd.f32 %v656_v38, %v648_v40 }
  0xfd   : > { %669 = vst.msk [vmem:[#allocation2 + $0x28] sm:$0xff] %vm663_vm2, %v662_v42 }
  0xfe PF: > { %v728_v43 = vld [vmem:[#allocation2] sm:$0xff]  ;;  %vm734_vm3 = vcmask 523264   ;;  %v730_v44 = vld [vmem:[#allocation2 + $0x10] sm:$0xff]  ;;  %v729_v45 = vld [vmem:[#allocation2 + $0x8] sm:$0xff]  ;;  %v3585_v29 = vmov 0   ;;  %v814_v30 = vlaneseq  ;;  %s3586_s8 = smov 64  }
  0xff   : > { %v735_v46 = vsel %vm734_vm3, %v728_v43, 0.0  ;;  %v741_v47 = vsel %vm734_vm3, %v730_v44, 0.0  ;;  %v731_v48 = vld [vmem:[#allocation2 + $0x18] sm:$0xff]  ;;  %v738_v51 = vsel %vm734_vm3, %v729_v45, 0.0  ;;  %v3404_v21 = vld [vmem:[%s3692_s20 + $0x4] ss:$8 sps:$4 sm:$0xff]   ;;  %926 = vmatprep.mubr.bf16.mxu1 %v3585_v29  ;;  %3402 = vset.pattern.permute.xlu1 %v3585_v29 }
 0x100   : > { %736 = vadd.xlane.f32.xlu0 %v735_v46  ;;  %742 = vadd.xlane.f32.xlu1 %v741_v47  ;;  %v744_v52 = vsel %vm734_vm3, %v731_v48, 0.0  ;;  %v3406_v22 = vld [vmem:[%s3692_s20] ss:$8 sps:$4 sm:$0xff]   ;;  %v3407_v23 = vld [vmem:[%s3692_s20 + $0x14] ss:$8 sps:$4 sm:$0xff]   ;;  %v3818_v31 = vshrl.u32 %v814_v30, 7 }
 0x101   : > { %894 = vmatprep.subr.bf16.mxu1 %v3404_v21  ;;  %v3409_v24 = vld [vmem:[%s3692_s20 + $0x10] ss:$8 sps:$4 sm:$0xff]   ;;  %v3410_v25 = vld [vmem:[%s3692_s20 + $0x24] ss:$8 sps:$4 sm:$0xff]   ;;  %v3412_v26 = vld [vmem:[%s3692_s20 + $0x20] ss:$8 sps:$4 sm:$0xff]   ;;  %3403 = vset.pattern.permute.xlu0 %v3585_v29 }
 0x102   : > { %v732_v49 = vld [vmem:[#allocation2 + $0x20] sm:$0xff]  ;;  %895 = vmatpush1.bf16.msra.mxu1 %v3406_v22  ;;  %v3413_v27 = vld [vmem:[%s3692_s20 + $0x34] ss:$8 sps:$4 sm:$0xff]   ;;  %v3415_v28 = vld [vmem:[%s3692_s20 + $0x30] ss:$8 sps:$4 sm:$0xff]   ;;  %v978_v32 = vsub.s32 5, %v3818_v31 }
 0x103   : > { %v747_v53 = vsel %vm734_vm3, %v732_v49, 0.0  ;;  %896 = vmatprep.subr.bf16.mxu1 %v3407_v23  ;;  %v3822_v33 = vld [vmem:[%s3717_s21] sm:$0xff]  ;;  %v3587_v23 = vmov 0.0   ;;  %vm3588_vm4 = vmmov 0   ;;  %vm1023_vm5 = vcmask 130048   ;;  %s3589_s20 = smov 48  }
 0x104   : > { %v733_v50 = vld [vmem:[#allocation2 + $0x28] sm:$0xff]  ;;  %739 = vadd.xlane.f32.xlu0 %v738_v51  ;;  %745 = vadd.xlane.f32.xlu1 %v744_v52  ;;  %v979_v34 = vrot.slane %v3822_v33, %v978_v32  ;;  %v3416_v22 = vld [vmem:[%s3697_s23] sm:$0xff]   ;;  %s3590_s14 = smov 112   ;;  %s671_s25 = ssub.s32 0, %s3679_s30  ;;  %vm1099_vm8 = vcmask 392192  }
 0x105   : > { %v750_v54 = vsel %vm734_vm3, %v733_v50, 0.0  ;;  %3103 = vmatprep.subr.bf16.mxu0 %v3587_v23  ;;  %3105 = vmatprep.mubr.msk.bf16.mxu0 %vm3588_vm4, %v3587_v23  ;;  %s2887_s27 = smin.u32 %s3679_s30, %s671_s25  ;;  %p670_p5 = scmp.lt.s32.totalorder %s3679_s30, 0 }
 0x106   : > { %897 = vmatpush1.bf16.msra.mxu1 %v3409_v24  ;;  %3104 = vmatpush3.bf16.msra.mxu0 %v3416_v22  ;;  %s673_s28 = sand.u32 1, %s2887_s27   ;;  %s3593_s25 = smov 96  }
 0x107   : > { %898 = vmatprep.subr.bf16.mxu1 %v3410_v25  ;;  %3117 = vmatprep.subr.bf16.mxu0 %v3587_v23  ;;  %s674_s18 = ssub.s32 0, %s673_s28  ;;  %s3594_s27 = smov 16  }
 0x108   : > { %748 = vadd.xlane.f32.xlu0 %v747_v53  ;;  %751 = vadd.xlane.f32.xlu1 %v750_v54  ;;  %s4540_s18 = smov (!%p670_p5, %s674_s18), %s673_s28  ;;  %s3595_s28 = smov 80  }
 0x109   : > { %p2889_p6 = scmp.lt.s32.totalorder %s4540_s18, 0  ;;  %s680_s17 = sadd.s32 2, %s4540_s18 }
 0x10a   : > { %899 = vmatpush1.bf16.msra.mxu1 %v3412_v26  ;;  %p2959_p7 = scmp.ne.s32.totalorder %s3679_s30, 3 }
 0x10b   : > { %900 = vmatprep.subr.bf16.mxu1 %v3413_v27  ;;  %s4542_s17 = smov (!%p2889_p6, %s680_s17), %s4540_s18  ;;  %vm3597_vm13 = vmmov (!%p2959_p7), 0   ;;  %s4536_s4 = sld [smem:[#allocation5_spill]] (!%p2959_p7)  ;;  %vm2771_vm14 = vcmask (!%p2959_p7), 261120  }
 0x10c   : > { %s682_s22 = smul.u32 48, %s4542_s17 }
 0x10e   : > { %901 = vmatpush1.bf16.msra.mxu1 %v3415_v28  ;;  %s683_s5 = scalar_lea.vmem %s4517_s6, %s682_s22 }
 0x10f   : > { %3085 = vmatprep.subr.bf16.mxu1 %v3587_v23 }
 0x18d   : > { %v737_v55 = vpop.xlane.xlu0 %736  ;;  %v743_v56 = vpop.xlane.xlu1 %742 }
 0x18e   : > { %v754_v57 = vmul.f32 0.015625, %v737_v55  ;;  %v756_v58 = vmul.f32 0.015625, %v743_v56 }
 0x190   : > { %v3777_v59 = vsub.f32 %v728_v43, %v754_v57  ;;  %v3779_v60 = vsub.f32 %v730_v44, %v756_v58  ;;  %v826_v57 = vsub.s32 1, %v3818_v31 }
 0x191   : > { %v740_v61 = vpop.xlane.xlu0 %739  ;;  %v746_v62 = vpop.xlane.xlu1 %745 }
 0x192   : > { %v755_v63 = vmul.f32 0.015625, %v740_v61  ;;  %v757_v0 = vmul.f32 0.015625, %v746_v62  ;;  %v766_v1 = vmul.f32 %v3777_v59, %v3777_v59  ;;  %v768_v2 = vmul.f32 %v3779_v60, %v3779_v60 }
 0x194   : > { %v3785_v3 = vsub.f32 %v729_v45, %v755_v63  ;;  %v3787_v4 = vsub.f32 %v731_v48, %v757_v0  ;;  %v772_v5 = vsel %vm734_vm3, %v766_v1, 0.0  ;;  %v778_v8 = vsel %vm734_vm3, %v768_v2, 0.0 }
 0x195   : > { %773 = vadd.xlane.f32.xlu0 %v772_v5  ;;  %v749_v6 = vpop.xlane.xlu0 %748  ;;  %v752_v7 = vpop.xlane.xlu1 %751  ;;  %v827_v63 = vrot.slane %v3822_v33, %v826_v57 }
 0x196   : > { %v758_v9 = vmul.f32 0.015625, %v749_v6  ;;  %v759_v10 = vmul.f32 0.015625, %v752_v7  ;;  %v767_v11 = vmul.f32 %v3785_v3, %v3785_v3  ;;  %v769_v12 = vmul.f32 %v3787_v4, %v3787_v4 }
 0x198   : > { %v3795_v13 = vsub.f32 %v732_v49, %v758_v9  ;;  %v3797_v14 = vsub.f32 %v733_v50, %v759_v10  ;;  %v775_v15 = vsel %vm734_vm3, %v767_v11, 0.0  ;;  %v781_v16 = vsel %vm734_vm3, %v769_v12, 0.0 }
 0x199   : > { %779 = vadd.xlane.f32.xlu0 %v778_v8  ;;  %776 = vadd.xlane.f32.xlu1 %v775_v15  ;;  %v816_v50 = vsub.s32 0, %v3818_v31 }
 0x19a   : > { %v770_v17 = vmul.f32 %v3795_v13, %v3795_v13  ;;  %v771_v18 = vmul.f32 %v3797_v14, %v3797_v14 }
 0x19b   : > { %v817_v56 = vrot.slane %v3822_v33, %v816_v50 }
 0x19c   : > { %v784_v19 = vsel %vm734_vm3, %v770_v17, 0.0  ;;  %v787_v20 = vsel %vm734_vm3, %v771_v18, 0.0 }
 0x19d   : > { %782 = vadd.xlane.f32.xlu1 %v781_v16  ;;  %785 = vadd.xlane.f32.xlu0 %v784_v19 }
 0x1a1   : > { %788 = vadd.xlane.f32.xlu1 %v787_v20 }
 0x1b3   : > { %981 = vrot.lane.b32.xlu0 %v979_v34, %s3586_s8 }
 0x222   : > { %v774_v35 = vpop.xlane.xlu0 %773 }
 0x223   : > { %v790_v36 = vmul.f32 0.015625, %v774_v35 }
 0x225   : > { %v796_v37 = vadd.f32 1e-05, %v790_v36 }
 0x226   : > { %v777_v38 = vpop.xlane.xlu1 %776  ;;  %v780_v39 = vpop.xlane.xlu0 %779 }
 0x227   : > { %3432 = vrsqrt.f32 %v796_v37  ;;  %v791_v40 = vmul.f32 0.015625, %v777_v38  ;;  %v792_v41 = vmul.f32 0.015625, %v780_v39 }
 0x229   : > { %v797_v42 = vadd.f32 1e-05, %v791_v40  ;;  %v798_v43 = vadd.f32 1e-05, %v792_v41 }
 0x22a   : > { %v783_v44 = vpop.xlane.xlu1 %782  ;;  %v786_v45 = vpop.xlane.xlu0 %785 }
 0x22b   : > { %3434 = vrsqrt.f32 %v797_v42  ;;  %v793_v46 = vmul.f32 0.015625, %v783_v44  ;;  %v794_v48 = vmul.f32 0.015625, %v786_v45 }
 0x22c   : > { %3436 = vrsqrt.f32 %v798_v43 }
 0x22d   : > { %v799_v47 = vadd.f32 1e-05, %v793_v46  ;;  %v800_v53 = vadd.f32 1e-05, %v794_v48 }
 0x22e   : > { %v789_v49 = vpop.xlane.xlu1 %788  ;;  %v982_v25 = vpop.permute.xlu0 %981 }
 0x22f   : > { %3438 = vrsqrt.f32 %v799_v47  ;;  %v795_v51 = vmul.f32 0.015625, %v789_v49 }
 0x231   : > { %v3433_v52 = vpop.eup %3432  ;;  %v801_v54 = vadd.f32 1e-05, %v795_v51 }
 0x232   : > { %v808_v55 = vmul.f32 %v3433_v52, %v3777_v59 }
 0x233   : > { %3440 = vrsqrt.f32 %v801_v54 }
 0x234   : > { %3442 = vrsqrt.f32 %v800_v53  ;;  %v818_v62 = vmul.f32 %v817_v56, %v808_v55 }
 0x235   : > { %v3435_v58 = vpop.eup %3434 }
 0x236   : > { %v809_v61 = vmul.f32 %v3435_v58, %v3785_v3  ;;  %v3437_v0 = vpop.eup %3436  ;;  %v828_v6 = vadd.f32 %v827_v63, %v818_v62 }
 0x237   : > { %v810_v5 = vmul.f32 %v3437_v0, %v3779_v60 }
 0x238   : > { %v819_v1 = vmul.f32 %v817_v56, %v809_v61 }
 0x239   : > { %v3439_v2 = vpop.eup %3438  ;;  %v820_v11 = vmul.f32 %v817_v56, %v810_v5 }
 0x23a   : > { %v829_v7 = vadd.f32 %v827_v63, %v819_v1  ;;  %v811_v59 = vmul.f32 %v3439_v2, %v3787_v4 }
 0x23b   : > { %v830_v60 = vadd.f32 %v827_v63, %v820_v11 }
 0x23c   : > { %v834_v8 = vpack.c.bf16 %v829_v7, %v828_v6  ;;  %v821_v9 = vmul.f32 %v817_v56, %v811_v59 }
 0x23d   : > { %v3441_v10 = vpop.eup %3440 }
 0x23e   : > { %2899 = vmatmul.mubr.msk.bf16.vlgmr.msra.gmra.mrb[0].mxu1 %vm734_vm3, %v834_v8  ;;  %v3443_v3 = vpop.eup %3442  ;;  %v831_v12 = vadd.f32 %v827_v63, %v821_v9  ;;  %v813_v15 = vmul.f32 %v3441_v10, %v3797_v14  ;;  %v995_v14 = vsub.s32 6, %v3818_v31 }
 0x23f   : > { %936 = vmatprep.mubr.bf16.mxu1 %v3585_v29  ;;  %v812_v16 = vmul.f32 %v3443_v3, %v3795_v13  ;;  %v959_v13 = vsub.s32 4, %v3818_v31  ;;  %v684_v3 = vld [vmem:[%s683_s5] sm:$0xff] }
 0x240   : > { %v835_v17 = vpack.c.bf16 %v831_v12, %v830_v60  ;;  %v823_v18 = vmul.f32 %v817_v56, %v813_v15  ;;  %v996_v27 = vrot.slane %v3822_v33, %v995_v14  ;;  %v686_v12 = vld [vmem:[%s683_s5 + $0x10] sm:$0xff]  ;;  %v685_v15 = vld [vmem:[%s683_s5 + $0x8] sm:$0xff] }
 0x241   : > { %v822_v4 = vmul.f32 %v817_v56, %v812_v16  ;;  %v960_v24 = vrot.slane %v3822_v33, %v959_v13  ;;  %v687_v16 = vld [vmem:[%s683_s5 + $0x18] sm:$0xff]  ;;  %v689_v60 = vld [vmem:[%s683_s5 + $0x28] sm:$0xff] }
 0x242   : > { %v833_v19 = vadd.f32 %v827_v63, %v823_v18 }
 0x243   : > { %v832_v20 = vadd.f32 %v827_v63, %v822_v4 }
 0x245   : > { %v836_v21 = vpack.c.bf16 %v833_v19, %v832_v20 }
 0x246   : > { %2900 = vmatmul.mubr.msk.bf16.gmra.mrb[4].mxu1 %vm734_vm3, %v835_v17  ;;  %v688_v17 = vld [vmem:[%s683_s5 + $0x20] sm:$0xff] }
 0x247   : > { %946 = vmatprep.mubr.bf16.mxu1 %v3585_v29 }
 0x24e   : > { %2901 = vmatmul.mubr.msk.bf16.gmra.mrb[8].mxu1 %vm734_vm3, %v836_v21 }
 0x24f   : > { %3091 = vmatprep.mubr.msk.bf16.mxu1 %vm3588_vm4, %v3587_v23 }
 0x311   : > { %v928_v26 = vpop.f32.mrb[0].mxu1 }
 0x312   : > { %v961_v28 = vadd.f32 %v960_v24, %v928_v26  ;;  %v930_v29 = vpop.f32.mrb[1].mxu1  ;;  %v984_v32 = vadd.f32 %v982_v25, %v928_v26 }
 0x313   : > { %v932_v30 = vpop.f32.mrb[2].mxu1  ;;  %v997_v37 = vadd.f32 %v996_v27, %v930_v29 }
 0x314   : > { %v962_v34 = vadd.f32 %v960_v24, %v932_v30  ;;  %v985_v35 = vadd.f32 %v982_v25, %v932_v30  ;;  %v934_v36 = vpop.f32.mrb[3].mxu1  ;;  %v967_v39 = vmul.f32 0.25, %v961_v28  ;;  %v3417_v28 = vld [vmem:[%s3697_s23 + $0x8] sm:$0xff]  }
 0x315   : > { %v998_v38 = vadd.f32 %v996_v27, %v934_v36 }
 0x316   : > { %v968_v40 = vmul.f32 0.25, %v962_v34  ;;  %v3853_v41 = vpack.c.bf16 %v985_v35, %v984_v32 }
 0x317   : > { %v3855_v42 = vpack.c.bf16 %v998_v38, %v997_v37 }
 0x318   : > { %v3857_v43 = vpack.c.bf16 %v968_v40, %v967_v39  ;;  %1253 = vrot.lane.b32.xlu0 %v3853_v41, %s3589_s20  ;;  %1017 = vrot.lane.b32.xlu1 %v3853_v41, %s3586_s8 }
 0x319   : > { %v938_v33 = vpop.f32.mrb[4].mxu1  ;;  %3106 = vmatmul.mubr.msk.bf16.vlgmr.msra.gmra.mrb[0].mxu0 %vm1023_vm5, %v3855_v42 }
 0x31a   : > { %v963_v44 = vadd.f32 %v960_v24, %v938_v33  ;;  %v940_v45 = vpop.f32.mrb[5].mxu1  ;;  %3109 = vmatprep.mubr.msk.bf16.mxu0 %vm3588_vm4, %v3587_v23  ;;  %v986_v47 = vadd.f32 %v982_v25, %v938_v33 }
 0x31b   : > { %v942_v46 = vpop.f32.mrb[6].mxu1  ;;  %v999_v51 = vadd.f32 %v996_v27, %v940_v45 }
 0x31c   : > { %v964_v48 = vadd.f32 %v960_v24, %v942_v46  ;;  %v987_v49 = vadd.f32 %v982_v25, %v942_v46  ;;  %v944_v50 = vpop.f32.mrb[7].mxu1  ;;  %v969_v53 = vmul.f32 0.25, %v963_v44 }
 0x31d   : > { %v1000_v52 = vadd.f32 %v996_v27, %v944_v50 }
 0x31e   : > { %v970_v54 = vmul.f32 0.25, %v964_v48  ;;  %v3867_v55 = vpack.c.bf16 %v987_v49, %v986_v47 }
 0x31f   : > { %v3869_v56 = vpack.c.bf16 %v1000_v52, %v999_v51 }
 0x320   : > { %v3871_v57 = vpack.c.bf16 %v970_v54, %v969_v53  ;;  %1019 = vrot.lane.b32.xlu1 %v3867_v55, %s3586_s8 }
 0x321   : > { %v948_v58 = vpop.f32.mrb[8].mxu1  ;;  %3110 = vmatmul.mubr.msk.bf16.gmra.mrb[4].mxu0 %vm1023_vm5, %v3869_v56 }
 0x322   : > { %v965_v61 = vadd.f32 %v960_v24, %v948_v58  ;;  %v950_v62 = vpop.f32.mrb[9].mxu1  ;;  %3113 = vmatprep.mubr.msk.bf16.mxu0 %vm3588_vm4, %v3587_v23  ;;  %v988_v0 = vadd.f32 %v982_v25, %v948_v58 }
 0x323   : > { %v952_v63 = vpop.f32.mrb[10].mxu1  ;;  %v1001_v6 = vadd.f32 %v996_v27, %v950_v62  ;;  %v3591_v62 = vmov -1e+30  }
 0x324   : > { %v966_v1 = vadd.f32 %v960_v24, %v952_v63  ;;  %v989_v2 = vadd.f32 %v982_v25, %v952_v63  ;;  %v954_v5 = vpop.f32.mrb[11].mxu1  ;;  %v971_v59 = vmul.f32 0.25, %v965_v61 }
 0x325   : > { %v1002_v7 = vadd.f32 %v996_v27, %v954_v5 }
 0x326   : > { %v972_v8 = vmul.f32 0.25, %v966_v1  ;;  %v3879_v9 = vpack.c.bf16 %v989_v2, %v988_v0 }
 0x327   : > { %v3881_v10 = vpack.c.bf16 %v1002_v7, %v1001_v6 }
 0x328   : > { %v3883_v11 = vpack.c.bf16 %v972_v8, %v971_v59  ;;  %1257 = vrot.lane.b32.xlu0 %v3879_v9, %s3589_s20  ;;  %1021 = vrot.lane.b32.xlu1 %v3879_v9, %s3586_s8 }
 0x329   : > { %3114 = vmatmul.mubr.msk.bf16.gmra.mrb[8].mxu0 %vm1023_vm5, %v3881_v10 }
 0x32a   : > { %3123 = vmatprep.mubr.msk.bf16.mxu0 %vm3588_vm4, %v3587_v23 }
 0x32c   : > { %1249 = vrot.lane.b32.xlu0 %v3871_v57, %s3590_s14  ;;  %1255 = vrot.lane.b32.xlu1 %v3867_v55, %s3589_s20  ;;  %s690_s20 = scalar_lea.vmem %s4518_s7, %s4542_s17 }
 0x32d   : > { %v2890_v54 = vld [vmem:[%s690_s20] ss:$0 sm:$0xff] }
 0x330   : > { %1403 = vrot.lane.b32.xlu0 %v3855_v42, %s3590_s14  ;;  %1247 = vrot.lane.b32.xlu1 %v3857_v43, %s3590_s14 }
 0x334   : > { %1251 = vrot.lane.b32.xlu1 %v3883_v11, %s3590_s14  ;;  %1407 = vrot.lane.b32.xlu0 %v3881_v10, %s3590_s14 }
 0x338   : > { %1405 = vrot.lane.b32.xlu1 %v3869_v56, %s3590_s14  ;;  %696 = vperm.xlu0 %3403, %v685_v15   ;;  %s3592_s14 = smov 32  }
 0x33c   : > { %693 = vperm.xlu1 %3402, %v684_v3   ;;  %705 = vperm.xlu0 %3403, %v688_v17  }
 0x340   : > { %699 = vperm.xlu1 %3402, %v686_v12  }
 0x344   : > { %702 = vperm.xlu1 %3402, %v687_v16  }
 0x348   : > { %708 = vperm.xlu1 %3402, %v689_v60  }
 0x38a   : > { %v1254_v18 = vpop.permute.xlu0 %1253  ;;  %v1018_v4 = vpop.permute.xlu1 %1017 }
 0x38b   : > { %v1269_v19 = vsel %vm1023_vm5, %v1254_v18, 0  ;;  %v1034_v20 = vsel %vm1023_vm5, %v1018_v4, 0 }
 0x38c   : > { %3086 = vmatpush3.bf16.xpose.msra.mxu1 %v1034_v20  ;;  %3118 = vmatpush3.bf16.xpose.msra.mxu0 %v1269_v19 }
 0x38d   : > { %3087 = vmatprep.subr.bf16.mxu1 %v3587_v23  ;;  %3119 = vmatprep.subr.bf16.mxu0 %v3587_v23 }
 0x392   : > { %v1020_v21 = vpop.permute.xlu1 %1019 }
 0x393   : > { %v1037_v22 = vsel %vm1023_vm5, %v1020_v21, 0 }
 0x394   : > { %3088 = vmatpush3.bf16.xpose.msra.mxu1 %v1037_v22 }
 0x395   : > { %3089 = vmatprep.subr.bf16.mxu1 %v3587_v23 }
 0x39a   : > { %v1022_v13 = vpop.permute.xlu1 %1021  ;;  %v1258_v26 = vpop.permute.xlu0 %1257 }
 0x39b   : > { %v1040_v14 = vsel %vm1023_vm5, %v1022_v13, 0  ;;  %v1275_v27 = vsel %vm1023_vm5, %v1258_v26, 0 }
 0x39c   : > { %3090 = vmatpush3.bf16.xpose.msra.mxu1 %v1040_v14 }
 0x39d   : > { %3357 = vmatprep.subr.bf16.mxu1 %v3587_v23 }
 0x39e   : > { %v1256_v24 = vpop.permute.xlu1 %1255  ;;  %v1250_v30 = vpop.permute.xlu0 %1249 }
 0x39f   : > { %v1272_v25 = vsel %vm1023_vm5, %v1256_v24, 0 }
 0x3a0   : > { %3120 = vmatpush3.bf16.xpose.msra.mxu0 %v1272_v25 }
 0x3a1   : > { %3121 = vmatprep.subr.bf16.mxu0 %v3587_v23 }
 0x3a2   : > { %v1248_v29 = vpop.permute.xlu1 %1247  ;;  %v1404_v32 = vpop.permute.xlu0 %1403 }
 0x3a3   : > { %3092 = vmatmul.mubr.msk.bf16.vlgmr.msra.gmra.mrb[12].mxu1 %vm1023_vm5, %v3857_v43 }
 0x3a4   : > { %3360 = vmatpush3.bf16.xpose.msra.mxu1 %v1269_v19  ;;  %3095 = vmatprep.mubr.msk.bf16.mxu1 %vm3588_vm4, %v3587_v23 }
 0x3a5   : > { %3358 = vmatprep.subr.bf16.mxu1 %v3587_v23 }
 0x3a6   : > { %v1252_v34 = vpop.permute.xlu1 %1251  ;;  %v1408_v36 = vpop.permute.xlu0 %1407 }
 0x3a8   : > { %3122 = vmatpush3.bf16.xpose.msra.mxu0 %v1275_v27 }
 0x3a9   : > { %3135 = vmatprep.subr.bf16.mxu0 %v3587_v23 }
 0x3aa   : > { %v1406_v35 = vpop.permute.xlu1 %1405 }
 0x3ab   : > { %3096 = vmatmul.mubr.msk.bf16.gmra.mrb[16].mxu1 %vm1023_vm5, %v3871_v57 }
 0x3ac   : > { %3361 = vmatpush3.bf16.xpose.msra.mxu1 %v1272_v25  ;;  %3099 = vmatprep.mubr.msk.bf16.mxu1 %vm3588_vm4, %v3587_v23 }
 0x3ad   : > { %3359 = vmatprep.subr.bf16.mxu1 %v3587_v23 }
 0x3af   : > { %3124 = vmatmul.mubr.msk.bf16.vlgmr.msra.gmra.mrb[12].mxu0 %vm1023_vm5, %v1248_v29 }
 0x3b0   : > { %3136 = vmatpush3.bf16.msra.mxu0 %v3417_v28  ;;  %3137 = vmatprep.mubr.msk.bf16.mxu0 %vm3588_vm4, %v3587_v23 }
 0x3b1   : > { %3167 = vmatprep.subr.bf16.mxu0 %v3587_v23 }
 0x3b3   : > { %3100 = vmatmul.mubr.msk.bf16.gmra.mrb[20].mxu1 %vm1023_vm5, %v3883_v11 }
 0x3b4   : > { %3362 = vmatpush3.bf16.xpose.msra.mxu1 %v1275_v27  ;;  %3127 = vmatprep.mubr.msk.bf16.mxu1 %vm3588_vm4, %v3587_v23 }
 0x3b5   : > { %3149 = vmatprep.subr.bf16.mxu1 %v3587_v23 }
 0x3b7   : > { %3138 = vmatmul.mubr.msk.bf16.vlgmr.msra.gmra.mrb[16].mxu0 %vm1023_vm5, %v1404_v32  ;;  %v697_v61 = vpop.permute.xlu0 %696 }
 0x3b8   : > { %3141 = vmatprep.mubr.msk.bf16.mxu0 %vm3588_vm4, %v3587_v23  ;;  %vm715_vm7 = vcmp.eq.s32.totalorder %v697_v61, %v2890_v54 }
 0x3b9   : > { %v3966_v2 = vsel %vm715_vm7, 0.0, %v3591_v62 }
 0x3bb   : > { %3128 = vmatmul.mubr.msk.bf16.vlgmr.msra.gmra.mrb[24].mxu1 %vm1023_vm5, %v1250_v30  ;;  %v694_v58 = vpop.permute.xlu1 %693  ;;  %v706_v27 = vpop.permute.xlu0 %705 }
 0x3bc   : > { %3131 = vmatprep.mubr.msk.bf16.mxu1 %vm3588_vm4, %v3587_v23  ;;  %vm714_vm6 = vcmp.eq.s32.totalorder %v694_v58, %v2890_v54  ;;  %vm718_vm12 = vcmp.eq.s32.totalorder %v706_v27, %v2890_v54 }
 0x3bd   : > { %v3964_v63 = vsel %vm714_vm6, 0.0, %v3591_v62 }
 0x3bf   : > { %3142 = vmatmul.mubr.msk.bf16.gmra.mrb[20].mxu0 %vm1023_vm5, %v1406_v35  ;;  %v700_v0 = vpop.permute.xlu1 %699 }
 0x3c0   : > { %3145 = vmatprep.mubr.msk.bf16.mxu0 %vm3588_vm4, %v3587_v23  ;;  %vm716_vm9 = vcmp.eq.s32.totalorder %v700_v0, %v2890_v54 }
 0x3c1   : > { %v3978_v4 = vsel %vm716_vm9, 0.0, %v3591_v62 }
 0x3c3   : > { %3132 = vmatmul.mubr.msk.bf16.gmra.mrb[28].mxu1 %vm1023_vm5, %v1252_v34  ;;  %v703_v15 = vpop.permute.xlu1 %702 }
 0x3c4   : > { %3155 = vmatprep.mubr.msk.bf16.mxu1 %vm3588_vm4, %v3587_v23  ;;  %vm717_vm10 = vcmp.eq.s32.totalorder %v703_v15, %v2890_v54 }
 0x3c5   : > { %v3993_v32 = vsel %vm717_vm10, 0.0, %v3591_v62 }
 0x3c7   : > { %3146 = vmatmul.mubr.msk.bf16.gmra.mrb[24].mxu0 %vm1023_vm5, %v1408_v36  ;;  %v709_v19 = vpop.permute.xlu1 %708 }
 0x3c8   : > { %3173 = vmatprep.mubr.msk.bf16.mxu0 %vm3588_vm4, %v3587_v23  ;;  %vm719_vm11 = vcmp.eq.s32.totalorder %v709_v19, %v2890_v54 }
 0x3c9   : > { %v3995_v34 = vsel %vm719_vm11, 0.0, %v3591_v62 }
 0x3ec   : > { %v1215_v37 = vpop.f32.mrb[0].mxu0 }
 0x3ed   : > { %v3107_v38 = vpop.f32.mrb[1].mxu0 }
 0x3ee   : > { %v1218_v39 = vpop.f32.mrb[2].mxu0 }
 0x3ef   : > { %v1241_v40 = vpack.c.bf16 %v1218_v39, %v1215_v37  ;;  %v3108_v33 = vpop.f32.mrb[3].mxu0 }
 0x3f1   : > { %3168 = vmatpush3.bf16.msra.mxu0 %v1241_v40 }
 0x3f2   : > { %3169 = vmatprep.subr.bf16.mxu0 %v3587_v23 }
 0x3f4   : > { %v1223_v44 = vpop.f32.mrb[4].mxu0 }
 0x3f5   : > { %v3111_v45 = vpop.f32.mrb[5].mxu0 }
 0x3f6   : > { %v1226_v46 = vpop.f32.mrb[6].mxu0  ;;  %v4007_v45 = vsel %vm718_vm12, 0.0, %v3591_v62 }
 0x3f7   : > { %v1242_v47 = vpack.c.bf16 %v1226_v46, %v1223_v44  ;;  %v3112_v48 = vpop.f32.mrb[7].mxu0 }
 0x3f9   : > { %3170 = vmatpush3.bf16.msra.mxu0 %v1242_v47 }
 0x3fa   : > { %3171 = vmatprep.subr.bf16.mxu0 %v3587_v23 }
 0x3fc   : > { %v1231_v49 = vpop.f32.mrb[8].mxu0 }
 0x3fd   : > { %v3115_v50 = vpop.f32.mrb[9].mxu0 }
 0x3fe   : > { %v1234_v51 = vpop.f32.mrb[10].mxu0 }
 0x3ff   : > { %v1243_v52 = vpack.c.bf16 %v1234_v51, %v1231_v49  ;;  %v3116_v53 = vpop.f32.mrb[11].mxu0 }
 0x401   : > { %3172 = vmatpush3.bf16.msra.mxu0 %v1243_v52 }
 0x402   : > { %3185 = vmatprep.subr.bf16.mxu0 %v3587_v23 }
 0x476   : > { %v1076_v1 = vpop.f32.mrb[12].mxu1 }
 0x477   : > { %v3969_v5 = vadd.f32 %v1076_v1, %v3964_v63  ;;  %v3093_v6 = vpop.f32.mrb[13].mxu1 }
 0x478   : > { %v1079_v7 = vpop.f32.mrb[14].mxu1 }
 0x479   : > { %v3972_v59 = vadd.f32 %v1079_v7, %v3966_v2  ;;  %v3094_v8 = vpop.f32.mrb[15].mxu1  ;;  %v1100_v3 = vsel %vm1099_vm8, %v3969_v5, -inf }
 0x47a   : > { %1101 = vmax.xlane.f32.xlu0 %v1100_v3 }
 0x47b   : > { %v1103_v12 = vsel %vm1099_vm8, %v3972_v59, -inf }
 0x47c   : > { %1104 = vmax.xlane.f32.xlu1 %v1103_v12 }
 0x47e   : > { %v1084_v16 = vpop.f32.mrb[16].mxu1 }
 0x47f   : > { %v3097_v60 = vpop.f32.mrb[17].mxu1  ;;  %v3984_v14 = vadd.f32 %v1084_v16, %v3978_v4 }
 0x480   : > { %v1087_v17 = vpop.f32.mrb[18].mxu1 }
 0x481   : > { %v3098_v18 = vpop.f32.mrb[19].mxu1  ;;  %v3998_v36 = vadd.f32 %v1087_v17, %v3993_v32  ;;  %v1106_v39 = vsel %vm1099_vm8, %v3984_v14, -inf }
 0x482   : > { %v1311_v20 = vpop.f32.mrb[12].mxu0 }
 0x483   : > { %v3981_v21 = vadd.f32 %v1311_v20, %v3964_v63  ;;  %v3125_v22 = vpop.f32.mrb[13].mxu0  ;;  %v1109_v50 = vsel %vm1099_vm8, %v3998_v36, -inf }
 0x484   : > { %v1314_v13 = vpop.f32.mrb[14].mxu0 }
 0x485   : > { %v3987_v24 = vadd.f32 %v1314_v13, %v3966_v2  ;;  %v3126_v25 = vpop.f32.mrb[15].mxu0  ;;  %v1334_v26 = vsel %vm1099_vm8, %v3981_v21, -inf }
 0x486   : > { %v1092_v28 = vpop.f32.mrb[20].mxu1  ;;  %1335 = vmax.xlane.f32.xlu0 %v1334_v26 }
 0x487   : > { %v3101_v29 = vpop.f32.mrb[21].mxu1  ;;  %v1337_v30 = vsel %vm1099_vm8, %v3987_v24, -inf  ;;  %v4010_v47 = vadd.f32 %v1092_v28, %v4007_v45 }
 0x488   : > { %v1095_v35 = vpop.f32.mrb[22].mxu1  ;;  %1338 = vmax.xlane.f32.xlu1 %v1337_v30 }
 0x489   : > { %v4001_v37 = vadd.f32 %v1095_v35, %v3995_v34  ;;  %v3102_v38 = vpop.f32.mrb[23].mxu1  ;;  %v1112_v62 = vsel %vm1099_vm8, %v4010_v47, -inf }
 0x48a   : > { %v1458_v40 = vpop.f32.mrb[16].mxu0  ;;  %1107 = vmax.xlane.f32.xlu0 %v1106_v39 }
 0x48b   : > { %v3139_v33 = vpop.f32.mrb[17].mxu0  ;;  %v1115_v44 = vsel %vm1099_vm8, %v4001_v37, -inf }
 0x48c   : > { %v1461_v46 = vpop.f32.mrb[18].mxu0  ;;  %1116 = vmax.xlane.f32.xlu1 %v1115_v44 }
 0x48d   : > { %v1484_v48 = vpack.c.bf16 %v1461_v46, %v1458_v40  ;;  %v3140_v49 = vpop.f32.mrb[19].mxu0 }
 0x48e   : > { %v1319_v51 = vpop.f32.mrb[24].mxu1  ;;  %1110 = vmax.xlane.f32.xlu0 %v1109_v50 }
 0x48f   : > { %v3129_v52 = vpop.f32.mrb[25].mxu1  ;;  %3150 = vmatpush3.bf16.msra.mxu1 %v1484_v48  ;;  %v4016_v54 = vadd.f32 %v1319_v51, %v3978_v4 }
 0x490   : > { %v1322_v53 = vpop.f32.mrb[26].mxu1  ;;  %3151 = vmatprep.subr.bf16.mxu1 %v3587_v23 }
 0x491   : > { %v4019_v58 = vadd.f32 %v1322_v53, %v3993_v32  ;;  %v3130_v61 = vpop.f32.mrb[27].mxu1  ;;  %v1340_v12 = vsel %vm1099_vm8, %v4016_v54, -inf }
 0x492   : > { %v1466_v0 = vpop.f32.mrb[20].mxu0  ;;  %1113 = vmax.xlane.f32.xlu0 %v1112_v62 }
 0x493   : > { %v3143_v1 = vpop.f32.mrb[21].mxu0  ;;  %v1343_v6 = vsel %vm1099_vm8, %v4019_v58, -inf }
 0x494   : > { %v1469_v7 = vpop.f32.mrb[22].mxu0  ;;  %1344 = vmax.xlane.f32.xlu1 %v1343_v6 }
 0x495   : > { %v1485_v8 = vpack.c.bf16 %v1469_v7, %v1466_v0  ;;  %v3144_v3 = vpop.f32.mrb[23].mxu0 }
 0x496   : > { %v1327_v15 = vpop.f32.mrb[28].mxu1  ;;  %1341 = vmax.xlane.f32.xlu0 %v1340_v12 }
 0x497   : > { %v4028_v16 = vadd.f32 %v1327_v15, %v4007_v45  ;;  %v3133_v60 = vpop.f32.mrb[29].mxu1  ;;  %3152 = vmatpush3.bf16.msra.mxu1 %v1485_v8 }
 0x498   : > { %v1330_v17 = vpop.f32.mrb[30].mxu1  ;;  %3153 = vmatprep.subr.bf16.mxu1 %v3587_v23 }
 0x499   : > { %v4032_v18 = vadd.f32 %v1330_v17, %v3995_v34  ;;  %v3134_v19 = vpop.f32.mrb[31].mxu1  ;;  %v1346_v20 = vsel %vm1099_vm8, %v4028_v16, -inf }
 0x49a   : > { %v1474_v22 = vpop.f32.mrb[24].mxu0  ;;  %1347 = vmax.xlane.f32.xlu0 %v1346_v20 }
 0x49b   : > { %v3147_v13 = vpop.f32.mrb[25].mxu0  ;;  %v1349_v25 = vsel %vm1099_vm8, %v4032_v18, -inf }
 0x49c   : > { %v1477_v26 = vpop.f32.mrb[26].mxu0  ;;  %1350 = vmax.xlane.f32.xlu1 %v1349_v25 }
 0x49d   : > { %v1486_v27 = vpack.c.bf16 %v1477_v26, %v1474_v22  ;;  %v3148_v28 = vpop.f32.mrb[27].mxu0 }
 0x49f   : > { %3154 = vmatpush3.bf16.msra.mxu1 %v1486_v27 }
 0x4a0   : > { %3363 = vmatprep.subr.bf16.mxu1 %v3587_v23 }
 0x507   : > { %v1102_v29 = vpop.xlane.xlu0 %1101 }
 0x508   : > { %v1118_v30 = vsub.f32 %v3969_v5, %v1102_v29 }
 0x509   : > { %v1105_v35 = vpop.xlane.xlu1 %1104 }
 0x50a   : > { %v1124_v38 = vmul.f32 1.442695, %v1118_v30  ;;  %v1119_v39 = vsub.f32 %v3972_v59, %v1105_v35 }
 0x50c   : > { %3444 = vpow2.f32 %v1124_v38  ;;  %v1126_v40 = vmul.f32 1.442695, %v1119_v39 }
 0x50e   : > { %3446 = vpow2.f32 %v1126_v40 }
 0x513   : > { %v1336_v33 = vpop.xlane.xlu0 %1335 }
 0x514   : > { %v1352_v44 = vsub.f32 %v3981_v21, %v1336_v33 }
 0x515   : > { %v1339_v46 = vpop.xlane.xlu1 %1338 }
 0x516   : > { %v4042_v48 = vpop.eup %3444  ;;  %v1358_v49 = vmul.f32 1.442695, %v1352_v44  ;;  %v1353_v50 = vsub.f32 %v3987_v24, %v1339_v46 }
 0x517   : > { %v1108_v51 = vpop.xlane.xlu0 %1107  ;;  %v1136_v5 = vsel %vm1099_vm8, %v4042_v48, 0.0 }
 0x518   : > { %v4047_v52 = vpop.eup %3446  ;;  %3448 = vpow2.f32 %v1358_v49  ;;  %v1360_v59 = vmul.f32 1.442695, %v1353_v50  ;;  %v1120_v53 = vsub.f32 %v3984_v14, %v1108_v51  ;;  %1137 = vadd.xlane.f32.xlu0 %v1136_v5 }
 0x519   : > { %v1117_v61 = vpop.xlane.xlu1 %1116  ;;  %v1139_v21 = vsel %vm1099_vm8, %v4047_v52, 0.0 }
 0x51a   : > { %3450 = vpow2.f32 %v1360_v59  ;;  %v1128_v62 = vmul.f32 1.442695, %v1120_v53  ;;  %v1123_v0 = vsub.f32 %v4001_v37, %v1117_v61  ;;  %1140 = vadd.xlane.f32.xlu1 %v1139_v21 }
 0x51b   : > { %v1111_v24 = vpop.xlane.xlu0 %1110 }
 0x51c   : > { %3452 = vpow2.f32 %v1128_v62  ;;  %v1121_v1 = vsub.f32 %v3998_v36, %v1111_v24  ;;  %v1134_v6 = vmul.f32 1.442695, %v1123_v0 }
 0x51e   : > { %v1130_v7 = vmul.f32 1.442695, %v1121_v1 }
 0x51f   : > { %v1114_v8 = vpop.xlane.xlu0 %1113 }
 0x520   : > { %3454 = vpow2.f32 %v1130_v7  ;;  %v1122_v14 = vsub.f32 %v4010_v47, %v1114_v8 }
 0x521   : > { %v1345_v3 = vpop.xlane.xlu1 %1344  ;;  %3456 = vpow2.f32 %v1134_v6 }
 0x522   : > { %v4055_v12 = vpop.eup %3448  ;;  %v1132_v15 = vmul.f32 1.442695, %v1122_v14  ;;  %v1355_v60 = vsub.f32 %v4019_v58, %v1345_v3 }
 0x523   : > { %v1342_v17 = vpop.xlane.xlu0 %1341  ;;  %v1370_v37 = vsel %vm1099_vm8, %v4055_v12, 0.0 }
 0x524   : > { %v4060_v19 = vpop.eup %3450  ;;  %3458 = vpow2.f32 %v1132_v15  ;;  %v1364_v36 = vmul.f32 1.442695, %v1355_v60  ;;  %v1354_v20 = vsub.f32 %v4016_v54, %v1342_v17  ;;  %1371 = vadd.xlane.f32.xlu0 %v1370_v37 }
 0x525   : > { %v1373_v47 = vsel %vm1099_vm8, %v4060_v19, 0.0 }
 0x526   : > { %v4065_v22 = vpop.eup %3452  ;;  %3460 = vpow2.f32 %v1364_v36  ;;  %v1362_v13 = vmul.f32 1.442695, %v1354_v20  ;;  %1374 = vadd.xlane.f32.xlu1 %v1373_v47 }
 0x527   : > { %v1348_v58 = vpop.xlane.xlu0 %1347  ;;  %v1142_v25 = vsel %vm1099_vm8, %v4065_v22, 0.0 }
 0x528   : > { %3462 = vpow2.f32 %v1362_v13  ;;  %v1356_v26 = vsub.f32 %v4028_v16, %v1348_v58  ;;  %1143 = vadd.xlane.f32.xlu0 %v1142_v25 }
 0x529   : > { %v1351_v49 = vpop.xlane.xlu1 %1350 }
 0x52a   : > { %v4070_v27 = vpop.eup %3454  ;;  %v1366_v54 = vmul.f32 1.442695, %v1356_v26  ;;  %v1357_v50 = vsub.f32 %v4032_v18, %v1351_v49 }
 0x52b   : > { %v1145_v28 = vsel %vm1099_vm8, %v4070_v27, 0.0  ;;  %v4074_v29 = vpop.eup %3456 }
 0x52c   : > { %3464 = vpow2.f32 %v1366_v54  ;;  %1146 = vadd.xlane.f32.xlu1 %v1145_v28  ;;  %v1151_v38 = vsel %vm1099_vm8, %v4074_v29, 0.0  ;;  %v1368_v51 = vmul.f32 1.442695, %v1357_v50 }
 0x52e   : > { %v4076_v30 = vpop.eup %3458  ;;  %3466 = vpow2.f32 %v1368_v51 }
 0x52f   : > { %v1148_v35 = vsel %vm1099_vm8, %v4076_v30, 0.0 }
 0x530   : > { %v4082_v16 = vpop.eup %3460  ;;  %1149 = vadd.xlane.f32.xlu0 %v1148_v35  ;;  %1152 = vadd.xlane.f32.xlu1 %v1151_v38 }
 0x531   : > { %v1379_v33 = vsel %vm1099_vm8, %v4082_v16, 0.0 }
 0x532   : > { %v4084_v39 = vpop.eup %3462 }
 0x533   : > { %v1376_v40 = vsel %vm1099_vm8, %v4084_v39, 0.0 }
 0x534   : > { %1377 = vadd.xlane.f32.xlu0 %v1376_v40  ;;  %1380 = vadd.xlane.f32.xlu1 %v1379_v33 }
 0x536   : > { %v4090_v44 = vpop.eup %3464 }
 0x537   : > { %v1382_v46 = vsel %vm1099_vm8, %v4090_v44, 0.0 }
 0x538   : > { %1383 = vadd.xlane.f32.xlu0 %v1382_v46  ;;  %v4104_v5 = vpop.eup %3466 }
 0x539   : > { %v1385_v59 = vsel %vm1099_vm8, %v4104_v5, 0.0 }
 0x545   : > { %1627 = vrot.lane.b32.xlu1 %v3867_v55, %s3592_s14 }
 0x549   : > { %1629 = vrot.lane.b32.xlu1 %v3879_v9, %s3592_s14 }
 0x54e   : > { %1625 = vrot.lane.b32.xlu0 %v3853_v41, %s3592_s14  ;;  %s4537_s14 = sld [smem:[#allocation7_spill]] (!%p2959_p7) }
 0x552   : > { %1621 = vrot.lane.b32.xlu0 %v3871_v57, %s3593_s25 }
 0x556   : > { %1772 = vrot.lane.b32.xlu0 %v3855_v42, %s3593_s25 }
 0x55a   : > { %1776 = vrot.lane.b32.xlu0 %v3881_v10, %s3593_s25 }
 0x55e   : > { %1936 = vrot.lane.b32.xlu0 %v3867_v55, %s3594_s27 }
 0x562   : > { %1928 = vrot.lane.b32.xlu0 %v3857_v43, %s3595_s28 }
 0x56d   : > { %1386 = vadd.xlane.f32.xlu1 %v1385_v59 }
 0x57e   : > { %1619 = vrot.lane.b32.xlu1 %v3857_v43, %s3593_s25 }
 0x582   : > { %1623 = vrot.lane.b32.xlu1 %v3883_v11, %s3593_s25 }
 0x586   : > { %1774 = vrot.lane.b32.xlu1 %v3869_v56, %s3593_s25 }
 0x58a   : > { %1934 = vrot.lane.b32.xlu1 %v3853_v41, %s3594_s27 }
 0x58e   : > { %1938 = vrot.lane.b32.xlu1 %v3879_v9, %s3594_s27 }
 0x592   : > { %1930 = vrot.lane.b32.xlu1 %v3871_v57, %s3595_s28 }
 0x5a5   : > { %v1138_v55 = vpop.xlane.xlu0 %1137 }
 0x5a6   : > { %3468 = vrcp.f32 %v1138_v55 }
 0x5a7   : > { %v1141_v18 = vpop.xlane.xlu1 %1140 }
 0x5a8   : > { %3470 = vrcp.f32 %v1141_v18 }
 0x5b0   : > { %v3469_v53 = vpop.eup %3468 }
 0x5b1   : > { %v1372_v61 = vpop.xlane.xlu0 %1371  ;;  %v1155_v43 = vmul.f32 %v3469_v53, %v4042_v48 }
 0x5b2   : > { %v3471_v21 = vpop.eup %3470  ;;  %3472 = vrcp.f32 %v1372_v61 }
 0x5b3   : > { %v1157_v62 = vmul.f32 %v3471_v21, %v4047_v52  ;;  %v1375_v0 = vpop.xlane.xlu1 %1374 }
 0x5b4   : > { %3474 = vrcp.f32 %v1375_v0 }
 0x5b5   : > { %v1238_v41 = vpack.c.bf16 %v1157_v62, %v1155_v43  ;;  %v1144_v24 = vpop.xlane.xlu0 %1143 }
 0x5b6   : > { %3476 = vrcp.f32 %v1144_v24 }
 0x5b7   : > { %3174 = vmatmul.mubr.msk.bf16.vlgmr.msra.gmra.mrb[28].mxu0 %vm1099_vm8, %v1238_v41 }
 0x5b8   : > { %3177 = vmatprep.mubr.msk.bf16.mxu0 %vm3588_vm4, %v3587_v23 }
 0x5b9   : > { %v1147_v57 = vpop.xlane.xlu1 %1146 }
 0x5ba   : > { %3478 = vrcp.f32 %v1147_v57 }
 0x5bc   : > { %v3473_v9 = vpop.eup %3472 }
 0x5bd   : > { %v1150_v1 = vpop.xlane.xlu0 %1149  ;;  %v1153_v6 = vpop.xlane.xlu1 %1152  ;;  %v1389_v48 = vmul.f32 %v3473_v9, %v4055_v12 }
 0x5be   : > { %v3475_v7 = vpop.eup %3474  ;;  %3480 = vrcp.f32 %v1150_v1 }
 0x5bf   : > { %v1391_v52 = vmul.f32 %v3475_v7, %v4060_v19  ;;  %3482 = vrcp.f32 %v1153_v6 }
 0x5c0   : > { %v3477_v15 = vpop.eup %3476 }
 0x5c1   : > { %v1481_v8 = vpack.c.bf16 %v1391_v52, %v1389_v48  ;;  %v1378_v14 = vpop.xlane.xlu0 %1377  ;;  %v1381_v3 = vpop.xlane.xlu1 %1380  ;;  %v1159_v37 = vmul.f32 %v3477_v15, %v4065_v22 }
 0x5c2   : > { %3484 = vrcp.f32 %v1378_v14 }
 0x5c3   : > { %3486 = vrcp.f32 %v1381_v3  ;;  %3156 = vmatmul.mubr.msk.bf16.vlgmr.msra.gmra.mrb[32].mxu1 %vm1099_vm8, %v1481_v8 }
 0x5c4   : > { %v3479_v60 = vpop.eup %3478  ;;  %3159 = vmatprep.mubr.msk.bf16.mxu1 %vm3588_vm4, %v3587_v23 }
 0x5c5   : > { %v1384_v17 = vpop.xlane.xlu0 %1383  ;;  %v1161_v12 = vmul.f32 %v3479_v60, %v4070_v27  ;;  %v1628_v28 = vpop.permute.xlu1 %1627 }
 0x5c6   : > { %v1644_v40 = vsel %vm1023_vm5, %v1628_v28, 0  ;;  %3488 = vrcp.f32 %v1384_v17 }
 0x5c7   : > { %v1239_v36 = vpack.c.bf16 %v1161_v12, %v1159_v37 }
 0x5c8   : > { %v3481_v19 = vpop.eup %3480 }
 0x5c9   : > { %v3483_v20 = vpop.eup %3482  ;;  %v1626_v47 = vpop.permute.xlu0 %1625  ;;  %3178 = vmatmul.mubr.msk.bf16.gmra.mrb[32].mxu0 %vm1099_vm8, %v1239_v36  ;;  %v1163_v58 = vmul.f32 %v3481_v19, %v4076_v30 }
 0x5ca   : > { %v1641_v13 = vsel %vm1023_vm5, %v1626_v47, 0  ;;  %3181 = vmatprep.mubr.msk.bf16.mxu0 %vm3588_vm4, %v3587_v23  ;;  %v1165_v25 = vmul.f32 %v3483_v20, %v4074_v29  ;;  %v1630_v29 = vpop.permute.xlu1 %1629 }
 0x5cb   : > { %3186 = vmatpush3.bf16.xpose.msra.mxu0 %v1641_v13  ;;  %3366 = vmatpush3.bf16.xpose.msra.mxu1 %v1641_v13  ;;  %v1647_v30 = vsel %vm1023_vm5, %v1630_v29, 0 }
 0x5cc   : > { %v3485_v22 = vpop.eup %3484  ;;  %3187 = vmatprep.subr.bf16.mxu0 %v3587_v23  ;;  %3364 = vmatprep.subr.bf16.mxu1 %v3587_v23  ;;  %v1240_v35 = vpack.c.bf16 %v1165_v25, %v1163_v58 }
 0x5cd   : > { %v3487_v26 = vpop.eup %3486  ;;  %v1393_v27 = vmul.f32 %v3485_v22, %v4084_v39  ;;  %v3418_v39 = vld [vmem:[%s3697_s23 + $0x10] sm:$0xff]   ;;  %v1622_v33 = vpop.permute.xlu0 %1621 }
 0x5ce   : > { %v1395_v54 = vmul.f32 %v3487_v26, %v4082_v16 }
 0x5d0   : > { %v1482_v38 = vpack.c.bf16 %v1395_v54, %v1393_v27  ;;  %v3489_v50 = vpop.eup %3488 }
 0x5d1   : > { %3182 = vmatmul.mubr.msk.bf16.gmra.mrb[36].mxu0 %vm1099_vm8, %v1240_v35  ;;  %v1773_v51 = vpop.permute.xlu0 %1772  ;;  %v1397_v18 = vmul.f32 %v3489_v50, %v4090_v44 }
 0x5d2   : > { %3160 = vmatmul.mubr.msk.bf16.gmra.mrb[36].mxu1 %vm1099_vm8, %v1482_v38  ;;  %3191 = vmatprep.mubr.msk.bf16.mxu0 %vm3588_vm4, %v3587_v23 }
 0x5d3   : > { %3188 = vmatpush3.bf16.xpose.msra.mxu0 %v1644_v40  ;;  %3367 = vmatpush3.bf16.xpose.msra.mxu1 %v1644_v40 }
 0x5d4   : > { %3189 = vmatprep.subr.bf16.mxu0 %v3587_v23  ;;  %3365 = vmatprep.subr.bf16.mxu1 %v3587_v23 }
 0x5d5   : > { %3163 = vmatprep.mubr.msk.bf16.mxu1 %vm3588_vm4, %v3587_v23  ;;  %v1777_v21 = vpop.permute.xlu0 %1776 }
 0x5d9   : > { %v1937_v44 = vpop.permute.xlu0 %1936 }
 0x5db   : > { %3190 = vmatpush3.bf16.xpose.msra.mxu0 %v1647_v30  ;;  %3368 = vmatpush3.bf16.xpose.msra.mxu1 %v1647_v30 }
 0x5dc   : > { %3203 = vmatprep.subr.bf16.mxu0 %v3587_v23  ;;  %3217 = vmatprep.subr.bf16.mxu1 %v3587_v23 }
 0x5dd   : > { %v1929_v24 = vpop.permute.xlu0 %1928 }
 0x5fa   : > { %v1387_v16 = vpop.xlane.xlu1 %1386 }
 0x5fb   : > { %3490 = vrcp.f32 %v1387_v16 }
 0x5fe   : > { %v1620_v46 = vpop.permute.xlu1 %1619 }
 0x5ff   : > { %3192 = vmatmul.mubr.msk.bf16.vlgmr.msra.gmra.mrb[40].mxu0 %vm1023_vm5, %v1620_v46 }
 0x600   : > { %3204 = vmatpush3.bf16.msra.mxu0 %v3418_v39  ;;  %3205 = vmatprep.mubr.msk.bf16.mxu0 %vm3588_vm4, %v3587_v23 }
 0x601   : > { %3235 = vmatprep.subr.bf16.mxu0 %v3587_v23 }
 0x602   : > { %v1624_v49 = vpop.permute.xlu1 %1623 }
 0x605   : > { %v3491_v59 = vpop.eup %3490 }
 0x606   : > { %v1775_v55 = vpop.permute.xlu1 %1774  ;;  %v1399_v53 = vmul.f32 %v3491_v59, %v4104_v5  ;;  %v1953_v5 = vsel %vm1023_vm5, %v1937_v44, 0 }
 0x607   : > { %3206 = vmatmul.mubr.msk.bf16.vlgmr.msra.gmra.mrb[44].mxu0 %vm1023_vm5, %v1773_v51 }
 0x608   : > { %v1483_v61 = vpack.c.bf16 %v1399_v53, %v1397_v18  ;;  %3209 = vmatprep.mubr.msk.bf16.mxu0 %vm3588_vm4, %v3587_v23 }
 0x60a   : > { %3164 = vmatmul.mubr.msk.bf16.gmra.mrb[40].mxu1 %vm1099_vm8, %v1483_v61  ;;  %v1935_v43 = vpop.permute.xlu1 %1934 }
 0x60b   : > { %v1950_v62 = vsel %vm1023_vm5, %v1935_v43, 0  ;;  %3195 = vmatprep.mubr.msk.bf16.mxu1 %vm3588_vm4, %v3587_v23 }
 0x60c   : > { %3236 = vmatpush3.bf16.xpose.msra.mxu0 %v1950_v62 }
 0x60d   : > { %3237 = vmatprep.subr.bf16.mxu0 %v3587_v23 }
 0x60e   : > { %v1939_v0 = vpop.permute.xlu1 %1938 }
 0x60f   : > { %3210 = vmatmul.mubr.msk.bf16.gmra.mrb[48].mxu0 %vm1023_vm5, %v1775_v55  ;;  %v1956_v41 = vsel %vm1023_vm5, %v1939_v0, 0 }
 0x610   : > { %3213 = vmatprep.mubr.msk.bf16.mxu0 %vm3588_vm4, %v3587_v23 }
 0x612   : > { %3196 = vmatmul.mubr.msk.bf16.vlgmr.msra.gmra.mrb[44].mxu1 %vm1023_vm5, %v1622_v33  ;;  %v1931_v57 = vpop.permute.xlu1 %1930 }
 0x613   : > { %3199 = vmatprep.mubr.msk.bf16.mxu1 %vm3588_vm4, %v3587_v23 }
 0x614   : > { %3238 = vmatpush3.bf16.xpose.msra.mxu0 %v1953_v5 }
 0x615   : > { %3239 = vmatprep.subr.bf16.mxu0 %v3587_v23 }
 0x617   : > { %3214 = vmatmul.mubr.msk.bf16.gmra.mrb[52].mxu0 %vm1023_vm5, %v1777_v21 }
 0x618   : > { %3241 = vmatprep.mubr.msk.bf16.mxu0 %vm3588_vm4, %v3587_v23 }
 0x61a   : > { %3200 = vmatmul.mubr.msk.bf16.gmra.mrb[48].mxu1 %vm1023_vm5, %v1624_v49 }
 0x61b   : > { %3223 = vmatprep.mubr.msk.bf16.mxu1 %vm3588_vm4, %v3587_v23 }
 0x61c   : > { %3240 = vmatpush3.bf16.xpose.msra.mxu0 %v1956_v41 }
 0x61d   : > { %3267 = vmatprep.subr.bf16.mxu0 %v3587_v23 }
 0x623   : > { %3242 = vmatmul.mubr.msk.bf16.vlgmr.msra.gmra.mrb[56].mxu0 %vm1023_vm5, %v1929_v24 }
 0x624   : > { %3245 = vmatprep.mubr.msk.bf16.mxu0 %vm3588_vm4, %v3587_v23 }
 0x62b   : > { %3246 = vmatmul.mubr.msk.bf16.gmra.mrb[60].mxu0 %vm1023_vm5, %v1931_v57 }
 0x62c   : > { %3249 = vmatprep.mubr.msk.bf16.mxu0 %vm3588_vm4, %v3587_v23 }
 0x68a   : > { %v1596_v9 = vpop.f32.mrb[28].mxu0 }
 0x68b   : > { %v3175_v1 = vpop.f32.mrb[29].mxu0 }
 0x68c   : > { %v1599_v6 = vpop.f32.mrb[30].mxu0 }
 0x68d   : > { %v3176_v7 = vpop.f32.mrb[31].mxu0 }
 0x696   : > { %v1530_v48 = vpop.f32.mrb[32].mxu1 }
 0x697   : > { %v4186_v52 = vadd.f32 %v1596_v9, %v1530_v48  ;;  %v3157_v8 = vpop.f32.mrb[33].mxu1 }
 0x698   : > { %v1533_v14 = vpop.f32.mrb[34].mxu1 }
 0x699   : > { %v4188_v3 = vadd.f32 %v1599_v6, %v1533_v14  ;;  %v3158_v15 = vpop.f32.mrb[35].mxu1 }
 0x69c   : > { %v1604_v60 = vpop.f32.mrb[32].mxu0 }
 0x69d   : > { %v3179_v17 = vpop.f32.mrb[33].mxu0 }
 0x69e   : > { %v1607_v37 = vpop.f32.mrb[34].mxu0 }
 0x69f   : > { %v3180_v12 = vpop.f32.mrb[35].mxu0 }
 0x6a4   : > { %v1612_v36 = vpop.f32.mrb[36].mxu0 }
 0x6a5   : > { %v1538_v19 = vpop.f32.mrb[36].mxu1  ;;  %v3183_v20 = vpop.f32.mrb[37].mxu0 }
 0x6a6   : > { %v4190_v47 = vadd.f32 %v1604_v60, %v1538_v19  ;;  %v3161_v13 = vpop.f32.mrb[37].mxu1  ;;  %v1615_v58 = vpop.f32.mrb[38].mxu0 }
 0x6a7   : > { %v1541_v25 = vpop.f32.mrb[38].mxu1  ;;  %v3184_v22 = vpop.f32.mrb[39].mxu0 }
 0x6a8   : > { %v4192_v26 = vadd.f32 %v1607_v37, %v1541_v25  ;;  %v3162_v27 = vpop.f32.mrb[39].mxu1 }
 0x6d2   : > { %v1683_v54 = vpop.f32.mrb[40].mxu0 }
 0x6d3   : > { %v4195_v28 = vadd.f32 %v1683_v54, %v3964_v63  ;;  %v3193_v35 = vpop.f32.mrb[41].mxu0 }
 0x6d4   : > { %v1686_v38 = vpop.f32.mrb[42].mxu0 }
 0x6d5   : > { %v4198_v40 = vadd.f32 %v1686_v38, %v3966_v2  ;;  %v3194_v29 = vpop.f32.mrb[43].mxu0  ;;  %v1706_v30 = vsel %vm1099_vm8, %v4195_v28, -inf }
 0x6d6   : > { %1707 = vmax.xlane.f32.xlu0 %v1706_v30 }
 0x6d7   : > { %v1709_v16 = vsel %vm1099_vm8, %v4198_v40, -inf }
 0x6d8   : > { %1710 = vmax.xlane.f32.xlu1 %v1709_v16 }
 0x6da   : > { %v1827_v39 = vpop.f32.mrb[44].mxu0 }
 0x6db   : > { %v3207_v33 = vpop.f32.mrb[45].mxu0 }
 0x6dc   : > { %v1830_v46 = vpop.f32.mrb[46].mxu0 }
 0x6dd   : > { %v1853_v49 = vpack.c.bf16 %v1830_v46, %v1827_v39  ;;  %v1546_v50 = vpop.f32.mrb[40].mxu1  ;;  %v3208_v51 = vpop.f32.mrb[47].mxu0 }
 0x6de   : > { %v4204_v59 = vadd.f32 %v1612_v36, %v1546_v50  ;;  %v3165_v55 = vpop.f32.mrb[41].mxu1 }
 0x6df   : > { %v1549_v18 = vpop.f32.mrb[42].mxu1  ;;  %3218 = vmatpush3.bf16.msra.mxu1 %v1853_v49 }
 0x6e0   : > { %v4206_v53 = vadd.f32 %v1615_v58, %v1549_v18  ;;  %v3166_v61 = vpop.f32.mrb[43].mxu1  ;;  %3219 = vmatprep.subr.bf16.mxu1 %v3587_v23 }
 0x6e2   : > { %v1835_v21 = vpop.f32.mrb[48].mxu0 }
 0x6e3   : > { %v3211_v43 = vpop.f32.mrb[49].mxu0 }
 0x6e4   : > { %v1838_v62 = vpop.f32.mrb[50].mxu0 }
 0x6e5   : > { %v1854_v44 = vpack.c.bf16 %v1838_v62, %v1835_v21  ;;  %v1691_v5 = vpop.f32.mrb[44].mxu1  ;;  %v3212_v0 = vpop.f32.mrb[51].mxu0 }
 0x6e6   : > { %v1692_v41 = vadd.f32 %v1691_v5, %v3978_v4  ;;  %v3197_v24 = vpop.f32.mrb[45].mxu1 }
 0x6e7   : > { %v1694_v57 = vpop.f32.mrb[46].mxu1  ;;  %3220 = vmatpush3.bf16.msra.mxu1 %v1854_v44 }
 0x6e8   : > { %v1695_v9 = vadd.f32 %v1694_v57, %v3993_v32  ;;  %v3198_v1 = vpop.f32.mrb[47].mxu1  ;;  %v1712_v6 = vsel %vm1099_vm8, %v1692_v41, -inf  ;;  %3221 = vmatprep.subr.bf16.mxu1 %v3587_v23 }
 0x6e9   : > { %1713 = vmax.xlane.f32.xlu1 %v1712_v6 }
 0x6ea   : > { %v1843_v7 = vpop.f32.mrb[52].mxu0  ;;  %v1715_v14 = vsel %vm1099_vm8, %v1695_v9, -inf }
 0x6eb   : > { %v3215_v48 = vpop.f32.mrb[53].mxu0 }
 0x6ec   : > { %1932 = vrot.lane.b32.xlu0 %v3883_v11, %s3595_s28  ;;  %v1846_v8 = vpop.f32.mrb[54].mxu0 }
 0x6ed   : > { %v1855_v15 = vpack.c.bf16 %v1846_v8, %v1843_v7  ;;  %1716 = vmax.xlane.f32.xlu1 %v1715_v14  ;;  %v1699_v60 = vpop.f32.mrb[48].mxu1  ;;  %v3216_v17 = vpop.f32.mrb[55].mxu0 }
 0x6ee   : > { %v1700_v37 = vadd.f32 %v1699_v60, %v4007_v45  ;;  %v3201_v12 = vpop.f32.mrb[49].mxu1 }
 0x6ef   : > { %v1702_v36 = vpop.f32.mrb[50].mxu1  ;;  %3222 = vmatpush3.bf16.msra.mxu1 %v1855_v15 }
 0x6f0   : > { %v1703_v19 = vadd.f32 %v1702_v36, %v3995_v34  ;;  %v3202_v20 = vpop.f32.mrb[51].mxu1  ;;  %v1718_v13 = vsel %vm1099_vm8, %v1700_v37, -inf  ;;  %3253 = vmatprep.subr.bf16.mxu1 %v3587_v23 }
 0x6f1   : > { %1719 = vmax.xlane.f32.xlu1 %v1718_v13 }
 0x6f2   : > { %v1721_v11 = vsel %vm1099_vm8, %v1703_v19, -inf }
 0x6f5   : > { %1722 = vmax.xlane.f32.xlu1 %v1721_v11 }
 0x6f6   : > { %v1992_v58 = vpop.f32.mrb[56].mxu0 }
 0x6f7   : > { %v3243_v25 = vpop.f32.mrb[57].mxu0 }
 0x6f8   : > { %v1995_v22 = vpop.f32.mrb[58].mxu0 }
 0x6f9   : > { %v3244_v27 = vpop.f32.mrb[59].mxu0  ;;  %v1996_v17 = vadd.f32 %v1995_v22, %v3966_v2 }
 0x6fe   : > { %v2000_v54 = vpop.f32.mrb[60].mxu0 }
 0x6ff   : > { %v3247_v35 = vpop.f32.mrb[61].mxu0  ;;  %v4244_v12 = vadd.f32 %v2000_v54, %v3978_v4 }
 0x700   : > { %v2003_v38 = vpop.f32.mrb[62].mxu0 }
 0x701   : > { %v3248_v29 = vpop.f32.mrb[63].mxu0  ;;  %v4249_v2 = vadd.f32 %v2003_v38, %v3993_v32 }
 0x763   : > { %v1708_v30 = vpop.xlane.xlu0 %1707 }
 0x764   : > { %v1724_v16 = vsub.f32 %v4195_v28, %v1708_v30 }
 0x765   : > { %v1711_v39 = vpop.xlane.xlu1 %1710 }
 0x766   : > { %v1730_v33 = vmul.f32 1.442695, %v1724_v16  ;;  %v1725_v46 = vsub.f32 %v4198_v40, %v1711_v39 }
 0x767   : > { %v1933_v49 = vpop.permute.xlu0 %1932 }
 0x768   : > { %3492 = vpow2.f32 %v1730_v33  ;;  %v1732_v50 = vmul.f32 1.442695, %v1725_v46  ;;  %3250 = vmatmul.mubr.msk.bf16.gmra.mrb[64].mxu0 %vm1023_vm5, %v1933_v49 }
 0x769   : > { %3273 = vmatprep.mubr.msk.bf16.mxu0 %vm3588_vm4, %v3587_v23 }
 0x76a   : > { %3494 = vpow2.f32 %v1732_v50 }
 0x772   : > { %v3493_v51 = vpop.eup %3492 }
 0x773   : > { %v1742_v55 = vsel %vm1099_vm8, %v3493_v51, 0.0 }
 0x774   : > { %v3495_v18 = vpop.eup %3494  ;;  %1743 = vadd.xlane.f32.xlu0 %v1742_v55 }
 0x775   : > { %v1745_v28 = vsel %vm1099_vm8, %v3495_v18, 0.0 }
 0x776   : > { %1746 = vadd.xlane.f32.xlu1 %v1745_v28  ;;  %v1714_v61 = vpop.xlane.xlu1 %1713 }
 0x777   : > { %v1726_v21 = vsub.f32 %v1692_v41, %v1714_v61 }
 0x779   : > { %v1734_v40 = vmul.f32 1.442695, %v1726_v21 }
 0x77a   : > { %v1717_v43 = vpop.xlane.xlu1 %1716 }
 0x77b   : > { %3496 = vpow2.f32 %v1734_v40  ;;  %v1727_v62 = vsub.f32 %v1695_v9, %v1717_v43 }
 0x77d   : > { %v1736_v44 = vmul.f32 1.442695, %v1727_v62 }
 0x77e   : > { %v1720_v5 = vpop.xlane.xlu1 %1719 }
 0x77f   : > { %3498 = vpow2.f32 %v1736_v44  ;;  %v1728_v0 = vsub.f32 %v1700_v37, %v1720_v5  ;;  %v4241_v37 = vadd.f32 %v1992_v58, %v3964_v63  ;;  %v3419_v58 = vld [vmem:[%s3697_s23 + $0x18] sm:$0xff]  }
 0x781   : > { %v1738_v24 = vmul.f32 1.442695, %v1728_v0  ;;  %v2015_v36 = vsel %vm1099_vm8, %v4241_v37, -inf }
 0x782   : > { %v1723_v57 = vpop.xlane.xlu1 %1722 }
 0x783   : > { %3500 = vpow2.f32 %v1738_v24  ;;  %v1729_v1 = vsub.f32 %v1703_v19, %v1723_v57 }
 0x785   : > { %v3497_v6 = vpop.eup %3496  ;;  %v1740_v7 = vmul.f32 1.442695, %v1729_v1 }
 0x786   : > { %v1748_v48 = vsel %vm1099_vm8, %v3497_v6, 0.0 }
 0x787   : > { %3502 = vpow2.f32 %v1740_v7  ;;  %1749 = vadd.xlane.f32.xlu1 %v1748_v48 }
 0x789   : > { %v3499_v8 = vpop.eup %3498 }
 0x78a   : > { %2083 = vrot.lane.b32.xlu0 %v3869_v56, %s3595_s28  ;;  %v1751_v41 = vsel %vm1099_vm8, %v3499_v8, 0.0  ;;  %v2018_v56 = vsel %vm1099_vm8, %v1996_v17, -inf }
 0x78b   : > { %1752 = vadd.xlane.f32.xlu1 %v1751_v41 }
 0x78d   : > { %v3501_v9 = vpop.eup %3500 }
 0x78e   : > { %v1754_v14 = vsel %vm1099_vm8, %v3501_v9, 0.0 }
 0x78f   : > { %1755 = vadd.xlane.f32.xlu1 %v1754_v14 }
 0x791   : > { %v3503_v15 = vpop.eup %3502 }
 0x792   : > { %v1757_v60 = vsel %vm1099_vm8, %v3503_v15, 0.0 }
 0x793   : > { %1758 = vadd.xlane.f32.xlu1 %v1757_v60 }
 0x7a4   : > { %2081 = vrot.lane.b32.xlu1 %v3855_v42, %s3595_s28  ;;  %v2021_v42 = vsel %vm1099_vm8, %v4244_v12, -inf }
 0x7a8   : > { %2085 = vrot.lane.b32.xlu1 %v3881_v10, %s3595_s28  ;;  %v2024_v10 = vsel %vm1099_vm8, %v4249_v2, -inf }
 0x7a9   : > { %2019 = vmax.xlane.f32.xlu0 %v2018_v56 }
 0x7cc   : > { %2016 = vmax.xlane.f32.xlu1 %v2015_v36 }
 0x7d0   : > { %2022 = vmax.xlane.f32.xlu1 %v2021_v42 }
 0x7d4   : > { %2025 = vmax.xlane.f32.xlu1 %v2024_v10 }
 0x801   : > { %v1744_v63 = vpop.xlane.xlu0 %1743 }
 0x802   : > { %3504 = vrcp.f32 %v1744_v63 }
 0x803   : > { %v1747_v4 = vpop.xlane.xlu1 %1746 }
 0x804   : > { %3506 = vrcp.f32 %v1747_v4 }
 0x80c   : > { %v3505_v19 = vpop.eup %3504 }
 0x80d   : > { %v1761_v13 = vmul.f32 %v3505_v19, %v3493_v51  ;;  %v2084_v51 = vpop.permute.xlu0 %2083 }
 0x80e   : > { %v3507_v20 = vpop.eup %3506 }
 0x80f   : > { %v1763_v11 = vmul.f32 %v3507_v20, %v3495_v18 }
 0x811   : > { %v1850_v25 = vpack.c.bf16 %v1763_v11, %v1761_v13 }
 0x813   : > { %3224 = vmatmul.mubr.msk.bf16.vlgmr.msra.gmra.mrb[52].mxu1 %vm1099_vm8, %v1850_v25 }
 0x814   : > { %v1750_v32 = vpop.xlane.xlu1 %1749  ;;  %3227 = vmatprep.mubr.msk.bf16.mxu1 %vm3588_vm4, %v3587_v23  ;;  %3254 = vmatpush3.bf16.msra.mxu1 %v3419_v58 }
 0x815   : > { %3285 = vmatprep.subr.bf16.mxu1 %v3587_v23  ;;  %3508 = vrcp.f32 %v1750_v32 }
 0x818   : > { %v1753_v22 = vpop.xlane.xlu1 %1752 }
 0x819   : > { %3510 = vrcp.f32 %v1753_v22 }
 0x81c   : > { %v1756_v27 = vpop.xlane.xlu1 %1755 }
 0x81d   : > { %3512 = vrcp.f32 %v1756_v27 }
 0x81f   : > { %v3509_v35 = vpop.eup %3508 }
 0x820   : > { %v1759_v54 = vpop.xlane.xlu1 %1758  ;;  %v1765_v29 = vmul.f32 %v3509_v35, %v3497_v6 }
 0x821   : > { %3514 = vrcp.f32 %v1759_v54 }
 0x823   : > { %v3511_v38 = vpop.eup %3510 }
 0x824   : > { %v1767_v30 = vmul.f32 %v3511_v38, %v3499_v8  ;;  %v2082_v18 = vpop.permute.xlu1 %2081 }
 0x826   : > { %v1851_v16 = vpack.c.bf16 %v1767_v30, %v1765_v29 }
 0x827   : > { %v3513_v39 = vpop.eup %3512 }
 0x828   : > { %3228 = vmatmul.mubr.msk.bf16.gmra.mrb[56].mxu1 %vm1099_vm8, %v1851_v16  ;;  %v1769_v46 = vmul.f32 %v3513_v39, %v3501_v9  ;;  %v2086_v1 = vpop.permute.xlu1 %2085 }
 0x829   : > { %3231 = vmatprep.mubr.msk.bf16.mxu1 %vm3588_vm4, %v3587_v23 }
 0x82b   : > { %v3515_v33 = vpop.eup %3514 }
 0x82c   : > { %v1771_v49 = vmul.f32 %v3515_v33, %v3503_v15 }
 0x82e   : > { %v1852_v50 = vpack.c.bf16 %v1771_v49, %v1769_v46 }
 0x830   : > { %3232 = vmatmul.mubr.msk.bf16.gmra.mrb[60].mxu1 %vm1099_vm8, %v1852_v50 }
 0x831   : > { %3255 = vmatprep.mubr.msk.bf16.mxu1 %vm3588_vm4, %v3587_v23 }
 0x836   : > { %v2020_v55 = vpop.xlane.xlu0 %2019 }
 0x837   : > { %v2034_v28 = vsub.f32 %v1996_v17, %v2020_v55 }
 0x838   : > { %3256 = vmatmul.mubr.msk.bf16.vlgmr.msra.gmra.mrb[64].mxu1 %vm1023_vm5, %v2082_v18 }
 0x839   : > { %v2041_v61 = vmul.f32 1.442695, %v2034_v28  ;;  %3259 = vmatprep.mubr.msk.bf16.mxu1 %vm3588_vm4, %v3587_v23 }
 0x83b   : > { %3516 = vpow2.f32 %v2041_v61  ;;  %v2008_v21 = vpop.f32.mrb[64].mxu0 }
 0x83c   : > { %v2009_v40 = vadd.f32 %v2008_v21, %v4007_v45  ;;  %v3251_v43 = vpop.f32.mrb[65].mxu0 }
 0x83d   : > { %v2011_v62 = vpop.f32.mrb[66].mxu0 }
 0x83e   : > { %v2012_v44 = vadd.f32 %v2011_v62, %v3995_v34  ;;  %v3252_v5 = vpop.f32.mrb[67].mxu0  ;;  %v2027_v0 = vsel %vm1099_vm8, %v2009_v40, -inf }
 0x83f   : > { %2028 = vmax.xlane.f32.xlu0 %v2027_v0 }
 0x840   : > { %3260 = vmatmul.mubr.msk.bf16.gmra.mrb[68].mxu1 %vm1023_vm5, %v2084_v51  ;;  %v2030_v24 = vsel %vm1099_vm8, %v2012_v44, -inf }
 0x841   : > { %2031 = vmax.xlane.f32.xlu1 %v2030_v24  ;;  %3263 = vmatprep.mubr.msk.bf16.mxu1 %vm3588_vm4, %v3587_v23 }
 0x845   : > { %v4276_v57 = vpop.eup %3516 }
 0x846   : > { %v2054_v45 = vsel %vm1099_vm8, %v4276_v57, 0.0 }
 0x847   : > { %2055 = vadd.xlane.f32.xlu1 %v2054_v45 }
 0x848   : > { %3264 = vmatmul.mubr.msk.bf16.gmra.mrb[72].mxu1 %vm1023_vm5, %v2086_v1 }
 0x849   : > { %3293 = vmatprep.mubr.msk.bf16.mxu1 %vm3588_vm4, %v3587_v23 }
 0x859   : > { %v2017_v34 = vpop.xlane.xlu1 %2016 }
 0x85a   : > { %v2033_v6 = vsub.f32 %v4241_v37, %v2017_v34 }
 0x85c   : > { %v2039_v7 = vmul.f32 1.442695, %v2033_v6 }
 0x85d   : > { %v2023_v48 = vpop.xlane.xlu1 %2022 }
 0x85e   : > { %3518 = vpow2.f32 %v2039_v7  ;;  %v2035_v8 = vsub.f32 %v4244_v12, %v2023_v48 }
 0x860   : > { %v2043_v41 = vmul.f32 1.442695, %v2035_v8 }
 0x861   : > { %v2026_v9 = vpop.xlane.xlu1 %2025 }
 0x862   : > { %3520 = vpow2.f32 %v2043_v41  ;;  %v2036_v14 = vsub.f32 %v4249_v2, %v2026_v9 }
 0x864   : > { %v2045_v15 = vmul.f32 1.442695, %v2036_v14 }
 0x866   : > { %3522 = vpow2.f32 %v2045_v15 }
 0x868   : > { %v4286_v60 = vpop.eup %3518 }
 0x869   : > { %v2051_v17 = vsel %vm1099_vm8, %v4286_v60, 0.0 }
 0x86a   : > { %2052 = vadd.xlane.f32.xlu0 %v2051_v17 }
 0x86c   : > { %v4290_v56 = vpop.eup %3520 }
 0x86d   : > { %v2057_v37 = vsel %vm1099_vm8, %v4290_v56, 0.0 }
 0x86e   : > { %2058 = vadd.xlane.f32.xlu0 %v2057_v37 }
 0x870   : > { %v4294_v12 = vpop.eup %3522 }
 0x871   : > { %v2060_v36 = vsel %vm1099_vm8, %v4294_v12, 0.0 }
 0x872   : > { %2061 = vadd.xlane.f32.xlu1 %v2060_v36 }
 0x8cc   : > { %v2029_v2 = vpop.xlane.xlu0 %2028 }
 0x8cd   : > { %v2037_v42 = vsub.f32 %v2009_v40, %v2029_v2 }
 0x8ce   : > { %v2032_v10 = vpop.xlane.xlu1 %2031 }
 0x8cf   : > { %v2047_v63 = vmul.f32 1.442695, %v2037_v42  ;;  %v2038_v4 = vsub.f32 %v2012_v44, %v2032_v10 }
 0x8d1   : > { %3524 = vpow2.f32 %v2047_v63  ;;  %v2049_v19 = vmul.f32 1.442695, %v2038_v4 }
 0x8d3   : > { %3526 = vpow2.f32 %v2049_v19  ;;  %v4345_v19 = vld [vmem:[%s3717_s21] sm:$0xff] }
 0x8d4   : > { %v2056_v40 = vpop.xlane.xlu1 %2055 }
 0x8db   : > { %v4298_v20 = vpop.eup %3524 }
 0x8dc   : > { %v2063_v13 = vsel %vm1099_vm8, %v4298_v20, 0.0 }
 0x8dd   : > { %v4302_v11 = vpop.eup %3526  ;;  %2064 = vadd.xlane.f32.xlu0 %v2063_v13 }
 0x8de   : > { %v2066_v58 = vsel %vm1099_vm8, %v4302_v11, 0.0 }
 0x8df   : > { %2067 = vadd.xlane.f32.xlu1 %v2066_v58 }
 0x8e6   : > { %v1899_v25 = vpop.f32.mrb[52].mxu1 }
 0x8e7   : > { %v4307_v32 = vadd.f32 %v1899_v25, %v4186_v52  ;;  %v3225_v22 = vpop.f32.mrb[53].mxu1 }
 0x8e8   : > { %v1902_v27 = vpop.f32.mrb[54].mxu1 }
 0x8e9   : > { %v4310_v54 = vadd.f32 %v1902_v27, %v4188_v3  ;;  %v3226_v35 = vpop.f32.mrb[55].mxu1 }
 0x8fb   : > { %v1907_v38 = vpop.f32.mrb[56].mxu1 }
 0x8fc   : > { %v4313_v29 = vadd.f32 %v1907_v38, %v4190_v47  ;;  %v3229_v30 = vpop.f32.mrb[57].mxu1  ;;  %v2053_v47 = vpop.xlane.xlu0 %2052  ;;  %v3566_v38 = vld [vmem:[#allocation2 + $0x8] sm:$0xff] }
 0x8fd   : > { %v1910_v16 = vpop.f32.mrb[58].mxu1  ;;  %3528 = vrcp.f32 %v2053_v47 }
 0x8fe   : > { %v4316_v39 = vadd.f32 %v1910_v16, %v4192_v26  ;;  %v3230_v33 = vpop.f32.mrb[59].mxu1  ;;  %3530 = vrcp.f32 %v2056_v40 }
 0x8ff   : > { %v2062_v43 = vpop.xlane.xlu1 %2061 }
 0x900   : > { %v2059_v5 = vpop.xlane.xlu0 %2058  ;;  %3532 = vrcp.f32 %v2062_v43 }
 0x901   : > { %3534 = vrcp.f32 %v2059_v5 }
 0x903   : > { %v1915_v46 = vpop.f32.mrb[60].mxu1 }
 0x904   : > { %v4319_v52 = vadd.f32 %v1915_v46, %v4204_v59  ;;  %v3233_v49 = vpop.f32.mrb[61].mxu1 }
 0x905   : > { %v1918_v50 = vpop.f32.mrb[62].mxu1 }
 0x906   : > { %v4322_v3 = vadd.f32 %v1918_v50, %v4206_v53  ;;  %v3234_v51 = vpop.f32.mrb[63].mxu1 }
 0x907   : > { %v3529_v0 = vpop.eup %3528  ;;  %v3567_v51 = vld [vmem:[#allocation2 + $0x10] sm:$0xff] }
 0x908   : > { %v3531_v45 = vpop.eup %3530  ;;  %v2070_v34 = vmul.f32 %v3529_v0, %v4286_v60 }
 0x909   : > { %v2072_v8 = vmul.f32 %v3531_v45, %v4276_v57  ;;  %v3570_v45 = vld [vmem:[#allocation2 + $0x28] sm:$0xff] }
 0x90a   : > { %v3533_v9 = vpop.eup %3532 }
 0x90b   : > { %v2136_v55 = vpop.f32.mrb[64].mxu1  ;;  %v2159_v41 = vpack.c.bf16 %v2072_v8, %v2070_v34  ;;  %v3535_v14 = vpop.eup %3534  ;;  %v2076_v15 = vmul.f32 %v3533_v9, %v4294_v12 }
 0x90c   : > { %v3257_v18 = vpop.f32.mrb[65].mxu1  ;;  %v2074_v60 = vmul.f32 %v3535_v14, %v4290_v56  ;;  %v2245_v56 = vsub.s32 7, %v3818_v31 }
 0x90d   : > { %v2139_v28 = vpop.f32.mrb[66].mxu1 }
 0x90e   : > { %v2162_v61 = vpack.c.bf16 %v2139_v28, %v2136_v55  ;;  %v3258_v21 = vpop.f32.mrb[67].mxu1  ;;  %v2160_v17 = vpack.c.bf16 %v2076_v15, %v2074_v60  ;;  %v2246_v13 = vrot.slane %v4345_v19, %v2245_v56 }
 0x910   : > { %3268 = vmatpush3.bf16.msra.mxu0 %v2162_v61  ;;  %v3568_v61 = vld [vmem:[#allocation2 + $0x18] sm:$0xff] }
 0x911   : > { %3269 = vmatprep.subr.bf16.mxu0 %v3587_v23 }
 0x913   : > { %v2144_v26 = vpop.f32.mrb[68].mxu1 }
 0x914   : > { %v3261_v59 = vpop.f32.mrb[69].mxu1 }
 0x915   : > { %v2147_v62 = vpop.f32.mrb[70].mxu1 }
 0x916   : > { %v2163_v44 = vpack.c.bf16 %v2147_v62, %v2144_v26  ;;  %v3262_v53 = vpop.f32.mrb[71].mxu1 }
 0x918   : > { %3270 = vmatpush3.bf16.msra.mxu0 %v2163_v44  ;;  %v3569_v44 = vld [vmem:[#allocation2 + $0x20] sm:$0xff] }
 0x919   : > { %3271 = vmatprep.subr.bf16.mxu0 %v3587_v23 }
 0x91b   : > { %v2152_v24 = vpop.f32.mrb[72].mxu1 }
 0x91c   : > { %v3265_v1 = vpop.f32.mrb[73].mxu1 }
 0x91d   : > { %v2155_v6 = vpop.f32.mrb[74].mxu1 }
 0x91e   : > { %v2164_v7 = vpack.c.bf16 %v2155_v6, %v2152_v24  ;;  %v3266_v48 = vpop.f32.mrb[75].mxu1 }
 0x920   : > { %3272 = vmatpush3.bf16.msra.mxu0 %v2164_v7 }
 0x921   : > { %3305 = vmatprep.subr.bf16.mxu0 %v3587_v23 }
 0x923   : > { %3274 = vmatmul.mubr.msk.bf16.vlgmr.msra.gmra.mrb[68].mxu0 %vm1099_vm8, %v2159_v41 }
 0x924   : > { %3277 = vmatprep.mubr.msk.bf16.mxu0 %vm3588_vm4, %v3587_v23 }
 0x92b   : > { %3278 = vmatmul.mubr.msk.bf16.gmra.mrb[72].mxu0 %vm1099_vm8, %v2160_v17 }
 0x92c   : > { %3281 = vmatprep.mubr.msk.bf16.mxu0 %vm3588_vm4, %v3587_v23 }
 0x96a   : > { %v2065_v57 = vpop.xlane.xlu0 %2064 }
 0x96b   : > { %3536 = vrcp.f32 %v2065_v57 }
 0x96c   : > { %v2068_v37 = vpop.xlane.xlu1 %2067 }
 0x96d   : > { %3538 = vrcp.f32 %v2068_v37 }
 0x975   : > { %v3537_v36 = vpop.eup %3536 }
 0x976   : > { %v2078_v42 = vmul.f32 %v3537_v36, %v4298_v20  ;;  %v3565_v20 = vld [vmem:[#allocation2] sm:$0xff] }
 0x977   : > { %v3539_v2 = vpop.eup %3538 }
 0x978   : > { %v2080_v10 = vmul.f32 %v3539_v2, %v4302_v11 }
 0x97a   : > { %v2161_v12 = vpack.c.bf16 %v2080_v10, %v2078_v42 }
 0x97c   : > { %3282 = vmatmul.mubr.msk.bf16.gmra.mrb[76].mxu0 %vm1099_vm8, %v2161_v12 }
 0x97d   : > { %3321 = vmatprep.mubr.msk.bf16.mxu0 %vm3588_vm4, %v3587_v23 }
 0x9f6   : > { %v2208_v63 = vpop.f32.mrb[68].mxu0 }
 0x9f7   : > { %v2231_v4 = vadd.f32 %v2208_v63, %v4307_v32  ;;  %v3275_v58 = vpop.f32.mrb[69].mxu0 }
 0x9f8   : > { %v2211_v25 = vpop.f32.mrb[70].mxu0  ;;  %v3421_v58 = vld [vmem:[%s3702_s26 + $0x8] sm:$0xff]  }
 0x9f9   : > { %v2237_v22 = vadd.f32 %v3565_v20, %v2231_v4  ;;  %v2232_v11 = vadd.f32 %v2211_v25, %v4310_v54  ;;  %v3276_v27 = vpop.f32.mrb[71].mxu0  ;;  %v3422_v25 = vld [vmem:[%s3702_s26 + $0x10] sm:$0xff]   ;;  %v3423_v20 = vld [vmem:[%s3702_s26 + $0x18] sm:$0xff]  }
 0x9fb   : > { %v4349_v35 = vadd.f32 %v2246_v13, %v2237_v22  ;;  %v2238_v30 = vadd.f32 %v3566_v38, %v2232_v11 }
 0x9fd   : > { %v4351_v16 = vadd.f32 %v2246_v13, %v2238_v30  ;;  %v2253_v32 = vsel %vm734_vm3, %v4349_v35, 0.0 }
 0x9fe   : > { %2254 = vadd.xlane.f32.xlu0 %v2253_v32  ;;  %v2216_v33 = vpop.f32.mrb[72].mxu0 }
 0x9ff   : > { %v2233_v46 = vadd.f32 %v2216_v33, %v4313_v29  ;;  %v3279_v49 = vpop.f32.mrb[73].mxu0  ;;  %v2256_v50 = vsel %vm734_vm3, %v4351_v16, 0.0 }
 0xa00   : > { %2257 = vadd.xlane.f32.xlu1 %v2256_v50  ;;  %v2219_v54 = vpop.f32.mrb[74].mxu0 }
 0xa01   : > { %v2239_v55 = vadd.f32 %v3567_v51, %v2233_v46  ;;  %v2234_v18 = vadd.f32 %v2219_v54, %v4316_v39  ;;  %v3280_v47 = vpop.f32.mrb[75].mxu0 }
 0xa03   : > { %v4359_v28 = vadd.f32 %v2246_v13, %v2239_v55  ;;  %v2240_v21 = vadd.f32 %v3568_v61, %v2234_v18 }
 0xa05   : > { %v4361_v40 = vadd.f32 %v2246_v13, %v2240_v21  ;;  %v2259_v29 = vsel %vm734_vm3, %v4359_v28, 0.0 }
 0xa06   : > { %2260 = vadd.xlane.f32.xlu0 %v2259_v29 }
 0xa07   : > { %v2262_v26 = vsel %vm734_vm3, %v4361_v40, 0.0 }
 0xa08   : > { %2263 = vadd.xlane.f32.xlu1 %v2262_v26  ;;  %v2333_v26 = vsub.s32 2, %v3818_v31 }
 0xa4f   : > { %v2224_v59 = vpop.f32.mrb[76].mxu0 }
 0xa50   : > { %v2235_v43 = vadd.f32 %v2224_v59, %v4319_v52  ;;  %v3283_v62 = vpop.f32.mrb[77].mxu0 }
 0xa51   : > { %v2227_v39 = vpop.f32.mrb[78].mxu0 }
 0xa52   : > { %v2241_v53 = vadd.f32 %v3569_v44, %v2235_v43  ;;  %v2236_v5 = vadd.f32 %v2227_v39, %v4322_v3  ;;  %v3284_v0 = vpop.f32.mrb[79].mxu0  ;;  %v2334_v44 = vrot.slane %v4345_v19, %v2333_v26 }
 0xa54   : > { %v4369_v24 = vadd.f32 %v2246_v13, %v2241_v53  ;;  %v2242_v1 = vadd.f32 %v3570_v45, %v2236_v5  ;;  %v2343_v53 = vsub.s32 3, %v3818_v31 }
 0xa56   : > { %v4371_v34 = vadd.f32 %v2246_v13, %v2242_v1  ;;  %v2265_v6 = vsel %vm734_vm3, %v4369_v24, 0.0  ;;  %v3420_v13 = vld [vmem:[%s3702_s26] sm:$0xff]   ;;  %v2344_v1 = vrot.slane %v4345_v19, %v2343_v53 }
 0xa57   : > { %2266 = vadd.xlane.f32.xlu0 %v2265_v6  ;;  %3286 = vmatpush3.bf16.msra.mxu1 %v3420_v13 }
 0xa58   : > { %v2268_v52 = vsel %vm734_vm3, %v4371_v34, 0.0  ;;  %3287 = vmatprep.subr.bf16.mxu1 %v3587_v23 }
 0xa59   : > { %2269 = vadd.xlane.f32.xlu1 %v2268_v52 }
 0xa5b   : > { %3288 = vmatpush3.bf16.msra.mxu1 %v3421_v58 }
 0xa5c   : > { %3289 = vmatprep.subr.bf16.mxu1 %v3587_v23 }
 0xa5f   : > { %3290 = vmatpush3.bf16.msra.mxu1 %v3422_v25 }
 0xa60   : > { %3291 = vmatprep.subr.bf16.mxu1 %v3587_v23 }
 0xa63   : > { %3292 = vmatpush3.bf16.msra.mxu1 %v3423_v20 }
 0xa8b   : > { %v2255_v7 = vpop.xlane.xlu0 %2254 }
 0xa8c   : > { %v2271_v48 = vmul.f32 0.015625, %v2255_v7 }
 0xa8d   : > { %v2258_v8 = vpop.xlane.xlu1 %2257 }
 0xa8e   : > { %v4378_v3 = vsub.f32 %v4349_v35, %v2271_v48  ;;  %v2272_v41 = vmul.f32 0.015625, %v2258_v8 }
 0xa90   : > { %v4381_v9 = vsub.f32 %v4351_v16, %v2272_v41  ;;  %v2283_v14 = vmul.f32 %v4378_v3, %v4378_v3 }
 0xa92   : > { %v2289_v15 = vsel %vm734_vm3, %v2283_v14, 0.0  ;;  %v2284_v60 = vmul.f32 %v4381_v9, %v4381_v9 }
 0xa93   : > { %v2261_v17 = vpop.xlane.xlu0 %2260  ;;  %2290 = vadd.xlane.f32.xlu0 %v2289_v15 }
 0xa94   : > { %v2273_v57 = vmul.f32 0.015625, %v2261_v17  ;;  %v2292_v37 = vsel %vm734_vm3, %v2284_v60, 0.0 }
 0xa95   : > { %2293 = vadd.xlane.f32.xlu1 %v2292_v37  ;;  %v2264_v36 = vpop.xlane.xlu1 %2263 }
 0xa96   : > { %v2279_v2 = vsub.f32 %v4359_v28, %v2273_v57  ;;  %v2274_v42 = vmul.f32 0.015625, %v2264_v36 }
 0xa98   : > { %v2280_v10 = vsub.f32 %v4361_v40, %v2274_v42  ;;  %v2285_v12 = vmul.f32 %v2279_v2, %v2279_v2 }
 0xa9a   : > { %v2295_v56 = vsel %vm734_vm3, %v2285_v12, 0.0  ;;  %v2286_v63 = vmul.f32 %v2280_v10, %v2280_v10 }
 0xa9b   : > { %2296 = vadd.xlane.f32.xlu0 %v2295_v56 }
 0xa9c   : > { %v2298_v4 = vsel %vm734_vm3, %v2286_v63, 0.0 }
 0xa9d   : > { %2299 = vadd.xlane.f32.xlu1 %v2298_v4 }
 0xae4   : > { %v2267_v22 = vpop.xlane.xlu0 %2266 }
 0xae5   : > { %v2275_v11 = vmul.f32 0.015625, %v2267_v22 }
 0xae6   : > { %v2270_v27 = vpop.xlane.xlu1 %2269 }
 0xae7   : > { %v2281_v38 = vsub.f32 %v4369_v24, %v2275_v11  ;;  %v2276_v30 = vmul.f32 0.015625, %v2270_v27  ;;  %v3424_v11 = vld [vmem:[%s3707_s29] sm:$0xff]  }
 0xae8   : > { %3306 = vmatpush3.bf16.msra.mxu0 %v3424_v11 }
 0xae9   : > { %v2282_v32 = vsub.f32 %v4371_v34, %v2276_v30  ;;  %v2287_v33 = vmul.f32 %v2281_v38, %v2281_v38  ;;  %3307 = vmatprep.subr.bf16.mxu0 %v3587_v23  ;;  %v3425_v30 = vld [vmem:[%s3707_s29 + $0x8] sm:$0xff]  }
 0xaeb   : > { %v2301_v46 = vsel %vm734_vm3, %v2287_v33, 0.0  ;;  %v2288_v49 = vmul.f32 %v2282_v32, %v2282_v32  ;;  %v3428_v33 = vld [vmem:[%s3707_s29 + $0x20] sm:$0xff]  }
 0xaec   : > { %2302 = vadd.xlane.f32.xlu0 %v2301_v46  ;;  %3308 = vmatpush3.bf16.msra.mxu0 %v3425_v30  ;;  %v3429_v46 = vld [vmem:[%s3707_s29 + $0x28] sm:$0xff]  }
 0xaed   : > { %v2304_v50 = vsel %vm734_vm3, %v2288_v49, 0.0  ;;  %3309 = vmatprep.subr.bf16.mxu0 %v3587_v23  ;;  %v3430_v49 = vld [vmem:[%s3707_s29 + $0x30] sm:$0xff]  }
 0xaee   : > { %2305 = vadd.xlane.f32.xlu1 %v2304_v50  ;;  %v3431_v50 = vld [vmem:[%s3707_s29 + $0x38] sm:$0xff]  }
 0xb20   : > { %v2291_v54 = vpop.xlane.xlu0 %2290 }
 0xb21   : > { %v2307_v51 = vmul.f32 0.015625, %v2291_v54  ;;  %v4437_v54 = vld [vmem:[%s546_s19] ss:$0 sm:$0xff]  ;;  %s4535_s19 = sld [smem:[#allocation4_spill]] (!%p2959_p7) }
 0xb22   : > { %v2294_v55 = vpop.xlane.xlu1 %2293 }
 0xb23   : > { %v2313_v18 = vadd.f32 1e-05, %v2307_v51  ;;  %v2308_v47 = vmul.f32 0.015625, %v2294_v55 }
 0xb25   : > { %3540 = vrsqrt.f32 %v2313_v18  ;;  %v2314_v61 = vadd.f32 1e-05, %v2308_v47 }
 0xb27   : > { %3542 = vrsqrt.f32 %v2314_v61 }
 0xb28   : > { %v2297_v21 = vpop.xlane.xlu0 %2296 }
 0xb29   : > { %v2309_v29 = vmul.f32 0.015625, %v2297_v21 }
 0xb2a   : > { %v2300_v59 = vpop.xlane.xlu1 %2299 }
 0xb2b   : > { %v2315_v43 = vadd.f32 1e-05, %v2309_v29  ;;  %v2310_v62 = vmul.f32 0.015625, %v2300_v59 }
 0xb2d   : > { %3544 = vrsqrt.f32 %v2315_v43  ;;  %v2316_v39 = vadd.f32 1e-05, %v2310_v62 }
 0xb2f   : > { %v3541_v5 = vpop.eup %3540  ;;  %3546 = vrsqrt.f32 %v2316_v39 }
 0xb30   : > { %v2325_v0 = vmul.f32 %v3541_v5, %v4378_v3 }
 0xb31   : > { %v3543_v45 = vpop.eup %3542 }
 0xb32   : > { %v2335_v6 = vmul.f32 %v2334_v44, %v2325_v0  ;;  %v2326_v52 = vmul.f32 %v3543_v45, %v4381_v9 }
 0xb34   : > { %v2336_v7 = vmul.f32 %v2334_v44, %v2326_v52  ;;  %v2345_v48 = vadd.f32 %v2344_v1, %v2335_v6 }
 0xb36   : > { %v2346_v8 = vadd.f32 %v2344_v1, %v2336_v7 }
 0xb37   : > { %v3545_v41 = vpop.eup %3544 }
 0xb38   : > { %v2327_v14 = vmul.f32 %v3545_v41, %v2279_v2  ;;  %v2351_v15 = vpack.c.bf16 %v2346_v8, %v2345_v48 }
 0xb39   : > { %v3547_v60 = vpop.eup %3546 }
 0xb3a   : > { %v2328_v17 = vmul.f32 %v3547_v60, %v2280_v10  ;;  %3294 = vmatmul.mubr.msk.bf16.vlgmr.msra.gmra.mrb[76].mxu1 %vm734_vm3, %v2351_v15  ;;  %v2337_v31 = vmul.f32 %v2334_v44, %v2327_v14 }
 0xb3b   : > { %3297 = vmatprep.mubr.msk.bf16.mxu1 %vm3588_vm4, %v3587_v23 }
 0xb3c   : > { %v2338_v3 = vmul.f32 %v2334_v44, %v2328_v17  ;;  %v2347_v57 = vadd.f32 %v2344_v1, %v2337_v31 }
 0xb3e   : > { %v2348_v19 = vadd.f32 %v2344_v1, %v2338_v3 }
 0xb40   : > { %v2352_v37 = vpack.c.bf16 %v2348_v19, %v2347_v57 }
 0xb42   : > { %3298 = vmatmul.mubr.msk.bf16.gmra.mrb[80].mxu1 %vm734_vm3, %v2352_v37 }
 0xb43   : > { %3301 = vmatprep.mubr.msk.bf16.mxu1 %vm3588_vm4, %v3587_v23 }
 0xb79   : > { %v2303_v9 = vpop.xlane.xlu0 %2302 }
 0xb7a   : > { %v2311_v36 = vmul.f32 0.015625, %v2303_v9 }
 0xb7b   : > { %v2306_v2 = vpop.xlane.xlu1 %2305 }
 0xb7c   : > { %v2317_v42 = vadd.f32 1e-05, %v2311_v36  ;;  %v2312_v10 = vmul.f32 0.015625, %v2306_v2 }
 0xb7e   : > { %3548 = vrsqrt.f32 %v2317_v42  ;;  %v2318_v12 = vadd.f32 1e-05, %v2312_v10 }
 0xb80   : > { %3550 = vrsqrt.f32 %v2318_v12 }
 0xb88   : > { %v3549_v56 = vpop.eup %3548 }
 0xb89   : > { %v2329_v63 = vmul.f32 %v3549_v56, %v2281_v38  ;;  %v3426_v38 = vld [vmem:[%s3707_s29 + $0x10] sm:$0xff]  }
 0xb8a   : > { %v3551_v4 = vpop.eup %3550  ;;  %3310 = vmatpush3.bf16.msra.mxu0 %v3426_v38 }
 0xb8b   : > { %v2330_v13 = vmul.f32 %v3551_v4, %v2282_v32  ;;  %v2339_v58 = vmul.f32 %v2334_v44, %v2329_v63  ;;  %3311 = vmatprep.subr.bf16.mxu0 %v3587_v23  ;;  %v3427_v32 = vld [vmem:[%s3707_s29 + $0x18] sm:$0xff]  }
 0xb8d   : > { %v2340_v25 = vmul.f32 %v2334_v44, %v2330_v13  ;;  %v2349_v20 = vadd.f32 %v2344_v1, %v2339_v58 }
 0xb8e   : > { %3312 = vmatpush3.bf16.msra.mxu0 %v3427_v32 }
 0xb8f   : > { %v2350_v22 = vadd.f32 %v2344_v1, %v2340_v25  ;;  %3313 = vmatprep.subr.bf16.mxu0 %v3587_v23 }
 0xb91   : > { %v2353_v27 = vpack.c.bf16 %v2350_v22, %v2349_v20 }
 0xb92   : > { %3314 = vmatpush3.bf16.msra.mxu0 %v3428_v33 }
 0xb93   : > { %3302 = vmatmul.mubr.msk.bf16.gmra.mrb[84].mxu1 %vm734_vm3, %v2353_v27  ;;  %3315 = vmatprep.subr.bf16.mxu0 %v3587_v23 }
 0xb96   : > { %3316 = vmatpush3.bf16.msra.mxu0 %v3429_v46 }
 0xb97   : > { %3317 = vmatprep.subr.bf16.mxu0 %v3587_v23 }
 0xb9a   : > { %3318 = vmatpush3.bf16.msra.mxu0 %v3430_v49 }
 0xb9b   : > { %3319 = vmatprep.subr.bf16.mxu0 %v3587_v23 }
 0xb9e   : > { %3320 = vmatpush3.bf16.msra.mxu0 %v3431_v50 }
 0xc0d   : > { %v2436_v51 = vpop.f32.mrb[76].mxu1 }
 0xc0e   : > { %v2437_v55 = vadd.f32 %v4437_v54, %v2436_v51  ;;  %v3295_v18 = vpop.f32.mrb[77].mxu1 }
 0xc0f   : > { %v2439_v47 = vpop.f32.mrb[78].mxu1 }
 0xc10   : > { %v2459_v61 = vmul.f32 %v2437_v55, %v2437_v55  ;;  %v2440_v21 = vadd.f32 %v4437_v54, %v2439_v47  ;;  %v3296_v29 = vpop.f32.mrb[79].mxu1 }
 0xc12   : > { %v2465_v26 = vmul.f32 %v2459_v61, %v2437_v55  ;;  %v2460_v59 = vmul.f32 %v2440_v21, %v2440_v21 }
 0xc14   : > { %v2471_v43 = vmul.f32 0.044715, %v2465_v26  ;;  %v2466_v62 = vmul.f32 %v2460_v59, %v2440_v21 }
 0xc15   : > { %v2444_v39 = vpop.f32.mrb[80].mxu1 }
 0xc16   : > { %v2477_v44 = vadd.f32 %v2471_v43, %v2437_v55  ;;  %v2472_v53 = vmul.f32 0.044715, %v2466_v62  ;;  %v2445_v5 = vadd.f32 %v4437_v54, %v2444_v39  ;;  %v3299_v0 = vpop.f32.mrb[81].mxu1 }
 0xc17   : > { %v2447_v45 = vpop.f32.mrb[82].mxu1 }
 0xc18   : > { %v2483_v1 = vmul.f32 0.7978846, %v2477_v44  ;;  %v2478_v6 = vadd.f32 %v2472_v53, %v2440_v21  ;;  %v2461_v52 = vmul.f32 %v2445_v5, %v2445_v5  ;;  %v2448_v7 = vadd.f32 %v4437_v54, %v2447_v45  ;;  %v3300_v48 = vpop.f32.mrb[83].mxu1 }
 0xc1a   : > { %3552 = vtanh.f32 %v2483_v1  ;;  %v2484_v8 = vmul.f32 0.7978846, %v2478_v6  ;;  %v2467_v41 = vmul.f32 %v2461_v52, %v2445_v5  ;;  %v2462_v14 = vmul.f32 %v2448_v7, %v2448_v7  ;;  %v2950_v1 = vld [vmem:[%s3717_s21 + $0x8] ss:$0 sm:$0xff] }
 0xc1c   : > { %3554 = vtanh.f32 %v2484_v8  ;;  %v2473_v15 = vmul.f32 0.044715, %v2467_v41  ;;  %v2468_v60 = vmul.f32 %v2462_v14, %v2448_v7 }
 0xc1e   : > { %v2479_v17 = vadd.f32 %v2473_v15, %v2445_v5  ;;  %v2474_v31 = vmul.f32 0.044715, %v2468_v60 }
 0xc20   : > { %v2485_v3 = vmul.f32 0.7978846, %v2479_v17  ;;  %v2480_v57 = vadd.f32 %v2474_v31, %v2448_v7 }
 0xc22   : > { %3556 = vtanh.f32 %v2485_v3  ;;  %v2486_v19 = vmul.f32 0.7978846, %v2480_v57 }
 0xc24   : > { %v3553_v37 = vpop.eup %3552  ;;  %3558 = vtanh.f32 %v2486_v19 }
 0xc25   : > { %v2495_v9 = vadd.f32 1.0, %v3553_v37 }
 0xc26   : > { %v3555_v36 = vpop.eup %3554 }
 0xc27   : > { %v2501_v2 = vmul.f32 0.5, %v2495_v9  ;;  %v2496_v42 = vadd.f32 1.0, %v3555_v36 }
 0xc29   : > { %v2502_v10 = vmul.f32 0.5, %v2496_v42  ;;  %v2507_v12 = vmul.f32 %v2501_v2, %v2437_v55 }
 0xc2b   : > { %v2508_v56 = vmul.f32 %v2502_v10, %v2440_v21 }
 0xc2c   : > { %v3557_v63 = vpop.eup %3556 }
 0xc2d   : > { %v2513_v4 = vpack.c.bf16 %v2508_v56, %v2507_v12  ;;  %v2497_v13 = vadd.f32 1.0, %v3557_v63  ;;  %v3596_v56 = vmov (!%p2959_p7), 0.0   ;;  %v3574_v63 = vld [vmem:[%s4535_s19 + $0x18] sm:$0xff] (!%p2959_p7)  }
 0xc2e   : > { %v3559_v58 = vpop.eup %3558  ;;  %3369 = vmatprep.subr.bf16.mxu1 (!%p2959_p7), %v3596_v56  ;;  %3333 = vmatprep.subr.bf16.mxu0 (!%p2959_p7), %v3596_v56 }
 0xc2f   : > { %3322 = vmatmul.mubr.bf16.vlgmr.msra.gmra.mrb[80].mxu0 %v2513_v4  ;;  %v2498_v25 = vadd.f32 1.0, %v3559_v58  ;;  %v2503_v20 = vmul.f32 0.5, %v2497_v13  ;;  %3345 = vmatprep.mubr.msk.bf16.mxu1 (!%p2959_p7), %vm3597_vm13, %v3596_v56 }
 0xc30   : > { %3325 = vmatprep.mubr.msk.bf16.mxu0 %vm3588_vm4, %v3587_v23 }
 0xc31   : > { %v2504_v22 = vmul.f32 0.5, %v2498_v25  ;;  %v2509_v11 = vmul.f32 %v2503_v20, %v2445_v5 }
 0xc33   : > { %v2510_v27 = vmul.f32 %v2504_v22, %v2448_v7 }
 0xc35   : > { %v2514_v30 = vpack.c.bf16 %v2510_v27, %v2509_v11 }
 0xc37   : > { %3326 = vmatmul.mubr.bf16.gmra.mrb[84].mxu0 %v2514_v30 }
 0xc38   : > { %3329 = vmatprep.mubr.msk.bf16.mxu0 %vm3588_vm4, %v3587_v23 }
 0xc66   : > { %v2452_v38 = vpop.f32.mrb[84].mxu1 }
 0xc67   : > { %v2453_v32 = vadd.f32 %v4437_v54, %v2452_v38  ;;  %v3303_v33 = vpop.f32.mrb[85].mxu1  ;;  %v2960_v38 = vld [vmem:[%s4536_s4] ss:$0 sm:$0xff] (!%p2959_p7) }
 0xc68   : > { %v2455_v46 = vpop.f32.mrb[86].mxu1 }
 0xc69   : > { %v2463_v49 = vmul.f32 %v2453_v32, %v2453_v32  ;;  %v2456_v50 = vadd.f32 %v4437_v54, %v2455_v46  ;;  %v3304_v51 = vpop.f32.mrb[87].mxu1 }
 0xc6b   : > { %v2469_v55 = vmul.f32 %v2463_v49, %v2453_v32  ;;  %v2464_v18 = vmul.f32 %v2456_v50, %v2456_v50 }
 0xc6d   : > { %v2475_v47 = vmul.f32 0.044715, %v2469_v55  ;;  %v2470_v61 = vmul.f32 %v2464_v18, %v2456_v50 }
 0xc6f   : > { %v2481_v21 = vadd.f32 %v2475_v47, %v2453_v32  ;;  %v2476_v29 = vmul.f32 0.044715, %v2470_v61 }
 0xc71   : > { %v2487_v26 = vmul.f32 0.7978846, %v2481_v21  ;;  %v2482_v59 = vadd.f32 %v2476_v29, %v2456_v50 }
 0xc73   : > { %3560 = vtanh.f32 %v2487_v26  ;;  %v2488_v23 = vmul.f32 0.7978846, %v2482_v59 }
 0xc75   : > { %3562 = vtanh.f32 %v2488_v23 }
 0xc7d   : > { %v3561_v43 = vpop.eup %3560 }
 0xc7e   : > { %v2499_v62 = vadd.f32 1.0, %v3561_v43 }
 0xc7f   : > { %v3563_v39 = vpop.eup %3562 }
 0xc80   : > { %v2500_v44 = vadd.f32 1.0, %v3563_v39  ;;  %v2505_v53 = vmul.f32 0.5, %v2499_v62 }
 0xc82   : > { %v2506_v5 = vmul.f32 0.5, %v2500_v44  ;;  %v2511_v54 = vmul.f32 %v2505_v53, %v2453_v32 }
 0xc84   : > { %v2512_v0 = vmul.f32 %v2506_v5, %v2456_v50 }
 0xc86   : > { %v2515_v45 = vpack.c.bf16 %v2512_v0, %v2511_v54 }
 0xc88   : > { %3330 = vmatmul.mubr.bf16.gmra.mrb[88].mxu0 %v2515_v45 }
 0xc89   : > { %3341 = vmatprep.mubr.msk.bf16.mxu0 (!%p2959_p7), %vm3597_vm13, %v3596_v56 }
 0xd02   : > { %v2618_v6 = vpop.f32.mrb[80].mxu0 }
 0xd03   : > { %v2619_v52 = vadd.f32 %v2950_v1, %v2618_v6  ;;  %v3323_v7 = vpop.f32.mrb[81].mxu0 }
 0xd04   : > { %v2621_v48 = vpop.f32.mrb[82].mxu0 }
 0xd05   : > { %v2641_v8 = vadd.f32 %v2619_v52, %v4349_v35  ;;  %v2622_v41 = vadd.f32 %v2950_v1, %v2621_v48  ;;  %v3324_v14 = vpop.f32.mrb[83].mxu0 }
 0xd07   : > { %2647 = vst.msk [vmem:[#allocation2] sm:$0xff] %vm734_vm3, %v2641_v8  ;;  %v2642_v15 = vadd.f32 %v2622_v41, %v4351_v16 }
 0xd09   : > { %2648 = vst.msk [vmem:[#allocation2 + $0x8] sm:$0xff] %vm734_vm3, %v2642_v15 }
 0xd0a   : > { %v2626_v60 = vpop.f32.mrb[84].mxu0 }
 0xd0b   : > { %v2627_v17 = vadd.f32 %v2950_v1, %v2626_v60  ;;  %v3327_v31 = vpop.f32.mrb[85].mxu0 }
 0xd0c   : > { %v2629_v3 = vpop.f32.mrb[86].mxu0 }
 0xd0d   : > { %v2643_v57 = vadd.f32 %v2627_v17, %v4359_v28  ;;  %v2630_v19 = vadd.f32 %v2950_v1, %v2629_v3  ;;  %v3328_v37 = vpop.f32.mrb[87].mxu0 }
 0xd0e   : > { %v2657_v58 = vld [vmem:[#allocation2] sm:$0xff] (!%p2959_p7) }
 0xd0f   : > { %2649 = vst.msk [vmem:[#allocation2 + $0x10] sm:$0xff] %vm734_vm3, %v2643_v57  ;;  %v2644_v35 = vadd.f32 %v2630_v19, %v4361_v40  ;;  %v3571_v40 = vld [vmem:[%s4535_s19] sm:$0xff] (!%p2959_p7)  }
 0xd10   : > { %3373 = vmatpush3.bf16.msra.mxu1 (!%p2959_p7), %v3571_v40  ;;  %3334 = vmatpush3.bf16.msra.mxu0 (!%p2959_p7), %v3571_v40  ;;  %v2658_v25 = vld [vmem:[#allocation2 + $0x8] sm:$0xff] (!%p2959_p7) }
 0xd11   : > { %2650 = vst.msk [vmem:[#allocation2 + $0x18] sm:$0xff] %vm734_vm3, %v2644_v35  ;;  %3370 = vmatprep.subr.bf16.mxu1 (!%p2959_p7), %v3596_v56  ;;  %3335 = vmatprep.subr.bf16.mxu0 (!%p2959_p7), %v3596_v56  ;;  %v2663_v22 = vpack.c.bf16 (!%p2959_p7), %v2658_v25, %v2657_v58 }
 0xd16   : > { %v2659_v4 = vld [vmem:[#allocation2 + $0x10] sm:$0xff] (!%p2959_p7) }
 0xd18   : > { %v2660_v13 = vld [vmem:[#allocation2 + $0x18] sm:$0xff] (!%p2959_p7) }
 0xd19   : > { %v2664_v20 = vpack.c.bf16 (!%p2959_p7), %v2660_v13, %v2659_v4 }
 0xd5b   : > { %v2634_v9 = vpop.f32.mrb[88].mxu0 }
 0xd5c   : > { %v2635_v36 = vadd.f32 %v2950_v1, %v2634_v9  ;;  %v3331_v2 = vpop.f32.mrb[89].mxu0  ;;  %2656 = sbr.rel (%p2959_p7) target bundleno = 3659 (0xe4b), region = 84 }
 0xd5d   : > { %v2637_v16 = vpop.f32.mrb[90].mxu0 }
 0xd5e   : > { %v2645_v42 = vadd.f32 %v2635_v36, %v4369_v24  ;;  %v2638_v10 = vadd.f32 %v2950_v1, %v2637_v16  ;;  %v3332_v12 = vpop.f32.mrb[91].mxu0  ;;  %v3572_v24 = vld [vmem:[%s4535_s19 + $0x8] sm:$0xff] (!%p2959_p7)  }
 0xd5f   : > { %3374 = vmatpush3.bf16.msra.mxu1 (!%p2959_p7), %v3572_v24  ;;  %3336 = vmatpush3.bf16.msra.mxu0 (!%p2959_p7), %v3572_v24 }
 0xd60   : > { %2651 = vst.msk [vmem:[#allocation2 + $0x20] sm:$0xff] %vm734_vm3, %v2645_v42  ;;  %v2646_v28 = vadd.f32 %v2638_v10, %v4371_v34  ;;  %v3573_v34 = vld [vmem:[%s4535_s19 + $0x10] sm:$0xff] (!%p2959_p7)   ;;  %3371 = vmatprep.subr.bf16.mxu1 (!%p2959_p7), %v3596_v56  ;;  %3337 = vmatprep.subr.bf16.mxu0 (!%p2959_p7), %v3596_v56 }
 0xd62   : > { %2652 = vst.msk [vmem:[#allocation2 + $0x28] sm:$0xff] %vm734_vm3, %v2646_v28 }
 0xd63   : > { %3375 = vmatpush3.bf16.msra.mxu1 %v3573_v34  ;;  %3338 = vmatpush3.bf16.msra.mxu0 %v3573_v34 }
 0xd64   : > { %3372 = vmatprep.subr.bf16.mxu1 %v3596_v56  ;;  %3339 = vmatprep.subr.bf16.mxu0 %v3596_v56 }
 0xd67   : > { %3376 = vmatpush3.bf16.msra.mxu1 %v3574_v63  ;;  %3340 = vmatpush3.bf16.msra.mxu0 %v3574_v63  ;;  %v2661_v11 = vld [vmem:[#allocation2 + $0x20] sm:$0xff] }
 0xd69   : > { %v2662_v27 = vld [vmem:[#allocation2 + $0x28] sm:$0xff] }
 0xd6a   : > { %3346 = vmatmul.mubr.msk.bf16.vlgmr.msra.gmra.mrb[0].mxu1 %vm734_vm3, %v2664_v20  ;;  %3342 = vmatmul.mubr.msk.bf16.vlgmr.msra.gmra.mrb[0].mxu0 %vm734_vm3, %v2663_v22  ;;  %v2665_v30 = vpack.c.bf16 %v2662_v27, %v2661_v11 }
 0xd6b   : > { %3349 = vmatprep.mubr.msk.bf16.mxu1 %vm3597_vm13, %v3596_v56 }
 0xd72   : > { %3350 = vmatmul.mubr.msk.bf16.gmra.mrb[4].mxu1 %vm734_vm3, %v2665_v30 }
 0xe3d   : > { %v2756_v32 = vpop.f32.mrb[0].mxu1  ;;  %v2748_v33 = vpop.f32.mrb[0].mxu0 }
 0xe3e   : > { %v2757_v46 = vadd.f32 %v2960_v38, %v2756_v32  ;;  %v3347_v49 = vpop.f32.mrb[1].mxu1  ;;  %v2749_v50 = vadd.f32 %v2960_v38, %v2748_v33  ;;  %v3343_v51 = vpop.f32.mrb[1].mxu0 }
 0xe3f   : > { %v2759_v55 = vpop.f32.mrb[2].mxu1  ;;  %v2751_v18 = vpop.f32.mrb[2].mxu0 }
 0xe40   : > { %2774 = vst.msk [vmem:[%s4537_s14 + $0x10] sm:$0xff] %vm2771_vm14, %v2757_v46  ;;  %v2760_v47 = vadd.f32 %v2960_v38, %v2759_v55  ;;  %v3348_v61 = vpop.f32.mrb[3].mxu1  ;;  %2772 = vst.msk [vmem:[%s4537_s14] sm:$0xff] %vm2771_vm14, %v2749_v50  ;;  %v2752_v21 = vadd.f32 %v2960_v38, %v2751_v18  ;;  %v3344_v29 = vpop.f32.mrb[3].mxu0 }
 0xe42   : > { %2775 = vst.msk [vmem:[%s4537_s14 + $0x18] sm:$0xff] %vm2771_vm14, %v2760_v47  ;;  %2773 = vst.msk [vmem:[%s4537_s14 + $0x8] sm:$0xff] %vm2771_vm14, %v2752_v21 }
 0xe45   : > { %v2764_v26 = vpop.f32.mrb[4].mxu1 }
 0xe46   : > { %v2765_v59 = vadd.f32 %v2960_v38, %v2764_v26  ;;  %v3351_v23 = vpop.f32.mrb[5].mxu1 }
 0xe47   : > { %v2767_v43 = vpop.f32.mrb[6].mxu1 }
 0xe48   : > { %2776 = vst.msk [vmem:[%s4537_s14 + $0x20] sm:$0xff] %vm2771_vm14, %v2765_v59  ;;  %v2768_v62 = vadd.f32 %v2960_v38, %v2767_v43  ;;  %v3352_v39 = vpop.f32.mrb[7].mxu1 }
 0xe4a   : > { %2777 = vst.msk [vmem:[%s4537_s14 + $0x28] sm:$0xff] %vm2771_vm14, %v2768_v62 }
 0xe4b PF: > { %s4538_s17 = sld [smem:[#allocation3_spill]] }
 0xe51   : > { %s24_s29 = sadd.s32 1, %s4538_s17  }
 0xe52   : > { %p21_p8 = scmp.ge.s32.totalorder %s24_s29, 6  }
 0xe54   :  { %23 = sbr.rel (!%p21_p8) target bundleno = 5 (0x5), region = 127 }

</bundles_post_ra>
